<compile_context>
chip_gen: v6e
topology: v6e:2x2x1
jax: 0.10.0
libtpu: 0.0.40
codegen_flags: <defaults>
</compile_context>

<pallas_src>
import jax
import jax.numpy as jnp
from jax.experimental import pallas as pl
from jax.experimental.pallas import tpu as pltpu


def _lstm_kernel(x_ref,      # (T, Bp, I)  f32 : batch-padded input, time-major
                 w_ih1_ref,  # (I, 4H)     f32 : gate cols permuted to [i, f, o, g]
                 b1_ref,     # (1, 4H)     f32 : b_ih1 + b_hh1 folded, permuted
                 w_hh1_ref,  # (H, 4H)     f32 : permuted
                 w_ih2_ref,  # (H, 4H)     f32 : permuted
                 w_hh2_ref,  # (H, 4H)     f32 : permuted
                 b2_ref,     # (1, 4H)     f32 : b_ih2 + b_hh2 folded, permuted
                 w_fc_ref,   # (H, Cp)     f32 : lane-padded classifier
                 b_fc_ref,   # (1, Cp)     f32
                 out_ref,    # (Bp, Cp)    f32
                 ):
    T, Bp, I = x_ref.shape
    H4 = w_ih1_ref.shape[1]
    H = H4 // 4

    # Hoist all weight loads and the b2 broadcast out of the recurrence.
    w_hh1 = w_hh1_ref[...]
    w_ih2 = w_ih2_ref[...]
    w_hh2 = w_hh2_ref[...]
    b2 = jnp.broadcast_to(b2_ref[...], (Bp, H4))

    # In-kernel non-recurrent layer-1 input projection (+ folded b1):
    # one lane-dense (T*Bp, I) @ (I, 4H) MXU matmul, done once before the loop.
    x_flat = x_ref[...].reshape(T * Bp, I)
    xw1 = (jnp.dot(x_flat, w_ih1_ref[...], preferred_element_type=jnp.float32)
           + b1_ref[...]).reshape(T, Bp, H4)

    def cell(gates, c):
        # Gate columns were permuted in the wrapper to [i, f, o | g]:
        # one sigmoid over 3H lanes, one tanh over H lanes.
        ifo = jax.nn.sigmoid(gates[:, :3 * H])
        g_g = jnp.tanh(gates[:, 3 * H:])
        i_g, f_g, o_g = ifo[:, :H], ifo[:, H:2 * H], ifo[:, 2 * H:]
        c_new = f_g * c + i_g * g_g
        h_new = o_g * jnp.tanh(c_new)
        return h_new, c_new

    zeros = jnp.zeros((Bp, H), jnp.float32)
    h1 = c1 = h2 = c2 = zeros
    # T is static and small -> fully unrolled serial recurrence (static indexing,
    # cross-step scheduling visibility). Cap unrolling if T grows beyond ~32.
    for t in range(T):
        # Layer 1: input projection already done (incl. b1); only the recurrent matmul.
        gates1 = xw1[t] + jnp.dot(h1, w_hh1, preferred_element_type=jnp.float32)
        h1, c1 = cell(gates1, c1)
        # Layer 2: two small dots, no concat. dot(h2, w_hh2) is independent of this
        # step's h1, so it can issue before layer-1 cell math finishes.
        gates2 = (jnp.dot(h1, w_ih2, preferred_element_type=jnp.float32)
                  + jnp.dot(h2, w_hh2, preferred_element_type=jnp.float32)
                  + b2)
        h2, c2 = cell(gates2, c2)

    # Final linear on the last timestep's layer-2 hidden state; full-tile lane-dense store.
    out_ref[...] = (jnp.dot(h2, w_fc_ref[...], preferred_element_type=jnp.float32)
                    + b_fc_ref[...])


@jax.jit
def simple_lstm_forward(x, params):
    """x: (B, T, input_size) float32 (batch_first, like the PyTorch module)."""
    (w_ih1, w_hh1, b1, w_ih2, w_hh2, b2, w_fc, b_fc) = params
    B, T, I = x.shape
    H = w_hh1.shape[0]
    C = w_fc.shape[1]

    # Pad batch to a full f32 sublane group; pad classes to a full lane group.
    Bp = ((B + 7) // 8) * 8
    Cp = ((C + 127) // 128) * 128

    x_p = jnp.pad(x, ((0, Bp - B), (0, 0), (0, 0)))           # (Bp, T, I)
    x_tbi = jnp.transpose(x_p, (1, 0, 2))                     # (T, Bp, I)

    # Permute gate columns from PyTorch order [i, f, g, o] to [i, f, o, g] so the kernel
    # needs only one sigmoid slice (3H) and one tanh slice (H) per cell.
    perm = jnp.concatenate([jnp.arange(0, 2 * H),
                            jnp.arange(3 * H, 4 * H),
                            jnp.arange(2 * H, 3 * H)])
    w_ih1p, w_hh1p, b1p = w_ih1[:, perm], w_hh1[:, perm], b1[:, perm]
    w_ih2p, w_hh2p, b2p = w_ih2[:, perm], w_hh2[:, perm], b2[:, perm]

    # Lane-pad the classifier so the final store is a full, unmasked tile write.
    w_fcp = jnp.pad(w_fc, ((0, 0), (0, Cp - C)))
    b_fcp = jnp.pad(b_fc, ((0, 0), (0, Cp - C)))

    vmem = pl.BlockSpec(memory_space=pltpu.MemorySpace.VMEM)
    out = pl.pallas_call(
        _lstm_kernel,
        out_shape=jax.ShapeDtypeStruct((Bp, Cp), jnp.float32),
        in_specs=[vmem] * 9,
        out_specs=vmem,
    )(x_tbi, w_ih1p, b1p, w_hh1p, w_ih2p, w_hh2p, b2p, w_fcp, b_fcp)
    return out[:B, :C]


def init_params(key, input_size, hidden_size, num_classes):
    """Deterministic parameter init (shapes match nn.LSTM / nn.Linear, stored transposed).

    Gate column order here is the PyTorch order [i, f, g, o]; the wrapper permutes.
    """
    ks = jax.random.split(key, 10)
    s = 1.0 / jnp.sqrt(hidden_size)
    H4 = 4 * hidden_size

    def u(k, shape):
        return jax.random.uniform(k, shape, jnp.float32, -s, s)

    # Layer 1 (input_size -> hidden_size); PyTorch stores (4H, in), we store (in, 4H).
    w_ih1 = u(ks[0], (input_size, H4))
    w_hh1 = u(ks[1], (hidden_size, H4))
    b1 = (u(ks[2], (1, H4)) + u(ks[3], (1, H4)))        # b_ih + b_hh folded
    # Layer 2 (hidden_size -> hidden_size)
    w_ih2 = u(ks[4], (hidden_size, H4))
    w_hh2 = u(ks[5], (hidden_size, H4))
    b2 = (u(ks[6], (1, H4)) + u(ks[7], (1, H4)))
    # Final linear (hidden_size -> num_classes)
    w_fc = u(ks[8], (hidden_size, num_classes))
    b_fc = u(ks[9], (1, num_classes))
    return (w_ih1, w_hh1, b1, w_ih2, w_hh2, b2, w_fc, b_fc)


def reference_forward(x, params):
    """Pure-JAX reference of the PyTorch SimpleLSTM.forward (for verification)."""
    (w_ih1, w_hh1, b1, w_ih2, w_hh2, b2, w_fc, b_fc) = params
    B, T, _ = x.shape
    H = w_hh1.shape[0]

    def run_layer(seq, w_ih, w_hh, b):
        h = jnp.zeros((B, H), jnp.float32)
        c = jnp.zeros((B, H), jnp.float32)
        outs = []
        for t in range(T):
            g = seq[:, t, :] @ w_ih + h @ w_hh + b
            i_g = jax.nn.sigmoid(g[:, 0 * H:1 * H])
            f_g = jax.nn.sigmoid(g[:, 1 * H:2 * H])
            g_g = jnp.tanh(g[:, 2 * H:3 * H])
            o_g = jax.nn.sigmoid(g[:, 3 * H:4 * H])
            c = f_g * c + i_g * g_g
            h = o_g * jnp.tanh(c)
            outs.append(h)
        return jnp.stack(outs, axis=1)

    out1 = run_layer(x, w_ih1, w_hh1, b1)
    out2 = run_layer(out1, w_ih2, w_hh2, b2)
    return out2[:, -1, :] @ w_fc + b_fc


if __name__ == "__main__":
    B, T, INPUT_SIZE, HIDDEN, NUM_CLASSES = 2, 8, 16, 32, 8

    key = jax.random.PRNGKey(0)
    k_x, k_p = jax.random.split(key)
    x = jax.random.normal(k_x, (B, T, INPUT_SIZE), jnp.float32)
    params = init_params(k_p, INPUT_SIZE, HIDDEN, NUM_CLASSES)

    out = simple_lstm_forward(x, params)
    out = jax.block_until_ready(out)

    ref = reference_forward(x, params)
    assert out.shape == (B, NUM_CLASSES)
    assert jnp.allclose(out, ref, atol=1e-5, rtol=1e-5), "mismatch vs reference"

    print("KERNEL_OK")
</pallas_src>

<mosaic_0001>
module attributes {stable_mosaic.version = 11 : i64} {
  func.func @_lstm_kernel(%arg0: memref<8x8x16xf32, #tpu.memory_space<vmem>>, %arg1: memref<16x128xf32, #tpu.memory_space<vmem>>, %arg2: memref<1x128xf32, #tpu.memory_space<vmem>>, %arg3: memref<32x128xf32, #tpu.memory_space<vmem>>, %arg4: memref<32x128xf32, #tpu.memory_space<vmem>>, %arg5: memref<32x128xf32, #tpu.memory_space<vmem>>, %arg6: memref<1x128xf32, #tpu.memory_space<vmem>>, %arg7: memref<32x128xf32, #tpu.memory_space<vmem>>, %arg8: memref<1x128xf32, #tpu.memory_space<vmem>>, %arg9: memref<8x128xf32, #tpu.memory_space<vmem>>) attributes {dimension_semantics = [], scalar_prefetch = 0 : i64, scratch_operands = 0 : i64, tpu.core_type = #tpu.core_type<tc>} {
    %c0 = arith.constant 0 : index
    %c0_0 = arith.constant 0 : index
    %0 = vector.load %arg3[%c0, %c0_0] : memref<32x128xf32, #tpu.memory_space<vmem>>, vector<32x128xf32>
    %c0_1 = arith.constant 0 : index
    %c0_2 = arith.constant 0 : index
    %1 = vector.load %arg4[%c0_1, %c0_2] : memref<32x128xf32, #tpu.memory_space<vmem>>, vector<32x128xf32>
    %c0_3 = arith.constant 0 : index
    %c0_4 = arith.constant 0 : index
    %2 = vector.load %arg5[%c0_3, %c0_4] : memref<32x128xf32, #tpu.memory_space<vmem>>, vector<32x128xf32>
    %c0_5 = arith.constant 0 : index
    %c0_6 = arith.constant 0 : index
    %3 = vector.load %arg6[%c0_5, %c0_6] : memref<1x128xf32, #tpu.memory_space<vmem>>, vector<1x128xf32>
    %4 = vector.shape_cast %3 : vector<1x128xf32> to vector<1x128xf32>
    %5 = vector.broadcast %4 : vector<1x128xf32> to vector<8x128xf32>
    %c0_7 = arith.constant 0 : index
    %c0_8 = arith.constant 0 : index
    %c0_9 = arith.constant 0 : index
    %6 = vector.load %arg0[%c0_7, %c0_8, %c0_9] : memref<8x8x16xf32, #tpu.memory_space<vmem>>, vector<8x8x16xf32>
    %7 = vector.shape_cast %6 : vector<8x8x16xf32> to vector<64x16xf32>
    %c0_10 = arith.constant 0 : index
    %c0_11 = arith.constant 0 : index
    %8 = vector.load %arg1[%c0_10, %c0_11] : memref<16x128xf32, #tpu.memory_space<vmem>>, vector<16x128xf32>
    %cst = arith.constant dense<0.000000e+00> : vector<64x128xf32>
    %9 = tpu.matmul %7, %8, %cst {dimension_numbers = #tpu.dot_dimension_numbers<[1], [0], [0], [1], [0, 0, 1, 1], [], []>} : vector<64x16xf32>, vector<16x128xf32>, vector<64x128xf32> -> vector<64x128xf32>
    %c0_12 = arith.constant 0 : index
    %c0_13 = arith.constant 0 : index
    %10 = vector.load %arg2[%c0_12, %c0_13] : memref<1x128xf32, #tpu.memory_space<vmem>>, vector<1x128xf32>
    %11 = vector.broadcast %10 : vector<1x128xf32> to vector<64x128xf32>
    %12 = arith.addf %9, %11 : vector<64x128xf32>
    %13 = vector.shape_cast %12 : vector<64x128xf32> to vector<8x8x128xf32>
    %cst_14 = arith.constant 0.000000e+00 : f32
    %14 = vector.broadcast %cst_14 : f32 to vector<8x32xf32>
    %15 = vector.extract_strided_slice %13 {offsets = [0, 0, 0], sizes = [1, 8, 128], strides = [1, 1, 1]} : vector<8x8x128xf32> to vector<1x8x128xf32>
    %16 = vector.shape_cast %15 : vector<1x8x128xf32> to vector<8x128xf32>
    %cst_15 = arith.constant dense<0.000000e+00> : vector<8x128xf32>
    %17 = tpu.matmul %14, %0, %cst_15 {dimension_numbers = #tpu.dot_dimension_numbers<[1], [0], [0], [1], [0, 0, 1, 1], [], []>} : vector<8x32xf32>, vector<32x128xf32>, vector<8x128xf32> -> vector<8x128xf32>
    %18 = arith.addf %16, %17 : vector<8x128xf32>
    %19 = vector.extract_strided_slice %18 {offsets = [0, 0], sizes = [8, 96], strides = [1, 1]} : vector<8x128xf32> to vector<8x96xf32>
    %20 = arith.negf %19 : vector<8x96xf32>
    %21 = math.exp %20 : vector<8x96xf32>
    %cst_16 = arith.constant 1.000000e+00 : f32
    %22 = vector.broadcast %cst_16 : f32 to vector<8x96xf32>
    %23 = arith.addf %22, %21 : vector<8x96xf32>
    %24 = arith.divf %22, %23 : vector<8x96xf32>
    %25 = vector.extract_strided_slice %18 {offsets = [0, 96], sizes = [8, 32], strides = [1, 1]} : vector<8x128xf32> to vector<8x32xf32>
    %26 = math.tanh %25 : vector<8x32xf32>
    %27 = vector.extract_strided_slice %24 {offsets = [0, 0], sizes = [8, 32], strides = [1, 1]} : vector<8x96xf32> to vector<8x32xf32>
    %28 = vector.extract_strided_slice %24 {offsets = [0, 32], sizes = [8, 32], strides = [1, 1]} : vector<8x96xf32> to vector<8x32xf32>
    %29 = vector.extract_strided_slice %24 {offsets = [0, 64], sizes = [8, 32], strides = [1, 1]} : vector<8x96xf32> to vector<8x32xf32>
    %30 = arith.mulf %28, %14 : vector<8x32xf32>
    %31 = arith.mulf %27, %26 : vector<8x32xf32>
    %32 = arith.addf %30, %31 : vector<8x32xf32>
    %33 = math.tanh %32 : vector<8x32xf32>
    %34 = arith.mulf %29, %33 : vector<8x32xf32>
    %cst_17 = arith.constant dense<0.000000e+00> : vector<8x128xf32>
    %35 = tpu.matmul %34, %1, %cst_17 {dimension_numbers = #tpu.dot_dimension_numbers<[1], [0], [0], [1], [0, 0, 1, 1], [], []>} : vector<8x32xf32>, vector<32x128xf32>, vector<8x128xf32> -> vector<8x128xf32>
    %cst_18 = arith.constant dense<0.000000e+00> : vector<8x128xf32>
    %36 = tpu.matmul %14, %2, %cst_18 {dimension_numbers = #tpu.dot_dimension_numbers<[1], [0], [0], [1], [0, 0, 1, 1], [], []>} : vector<8x32xf32>, vector<32x128xf32>, vector<8x128xf32> -> vector<8x128xf32>
    %37 = arith.addf %35, %36 : vector<8x128xf32>
    %38 = arith.addf %37, %5 : vector<8x128xf32>
    %39 = vector.extract_strided_slice %38 {offsets = [0, 0], sizes = [8, 96], strides = [1, 1]} : vector<8x128xf32> to vector<8x96xf32>
    %40 = arith.negf %39 : vector<8x96xf32>
    %41 = math.exp %40 : vector<8x96xf32>
    %cst_19 = arith.constant 1.000000e+00 : f32
    %42 = vector.broadcast %cst_19 : f32 to vector<8x96xf32>
    %43 = arith.addf %42, %41 : vector<8x96xf32>
    %44 = arith.divf %42, %43 : vector<8x96xf32>
    %45 = vector.extract_strided_slice %38 {offsets = [0, 96], sizes = [8, 32], strides = [1, 1]} : vector<8x128xf32> to vector<8x32xf32>
    %46 = math.tanh %45 : vector<8x32xf32>
    %47 = vector.extract_strided_slice %44 {offsets = [0, 0], sizes = [8, 32], strides = [1, 1]} : vector<8x96xf32> to vector<8x32xf32>
    %48 = vector.extract_strided_slice %44 {offsets = [0, 32], sizes = [8, 32], strides = [1, 1]} : vector<8x96xf32> to vector<8x32xf32>
    %49 = vector.extract_strided_slice %44 {offsets = [0, 64], sizes = [8, 32], strides = [1, 1]} : vector<8x96xf32> to vector<8x32xf32>
    %50 = arith.mulf %48, %14 : vector<8x32xf32>
    %51 = arith.mulf %47, %46 : vector<8x32xf32>
    %52 = arith.addf %50, %51 : vector<8x32xf32>
    %53 = math.tanh %52 : vector<8x32xf32>
    %54 = arith.mulf %49, %53 : vector<8x32xf32>
    %55 = vector.extract_strided_slice %13 {offsets = [1, 0, 0], sizes = [1, 8, 128], strides = [1, 1, 1]} : vector<8x8x128xf32> to vector<1x8x128xf32>
    %56 = vector.shape_cast %55 : vector<1x8x128xf32> to vector<8x128xf32>
    %cst_20 = arith.constant dense<0.000000e+00> : vector<8x128xf32>
    %57 = tpu.matmul %34, %0, %cst_20 {dimension_numbers = #tpu.dot_dimension_numbers<[1], [0], [0], [1], [0, 0, 1, 1], [], []>} : vector<8x32xf32>, vector<32x128xf32>, vector<8x128xf32> -> vector<8x128xf32>
    %58 = arith.addf %56, %57 : vector<8x128xf32>
    %59 = vector.extract_strided_slice %58 {offsets = [0, 0], sizes = [8, 96], strides = [1, 1]} : vector<8x128xf32> to vector<8x96xf32>
    %60 = arith.negf %59 : vector<8x96xf32>
    %61 = math.exp %60 : vector<8x96xf32>
    %cst_21 = arith.constant 1.000000e+00 : f32
    %62 = vector.broadcast %cst_21 : f32 to vector<8x96xf32>
    %63 = arith.addf %62, %61 : vector<8x96xf32>
    %64 = arith.divf %62, %63 : vector<8x96xf32>
    %65 = vector.extract_strided_slice %58 {offsets = [0, 96], sizes = [8, 32], strides = [1, 1]} : vector<8x128xf32> to vector<8x32xf32>
    %66 = math.tanh %65 : vector<8x32xf32>
    %67 = vector.extract_strided_slice %64 {offsets = [0, 0], sizes = [8, 32], strides = [1, 1]} : vector<8x96xf32> to vector<8x32xf32>
    %68 = vector.extract_strided_slice %64 {offsets = [0, 32], sizes = [8, 32], strides = [1, 1]} : vector<8x96xf32> to vector<8x32xf32>
    %69 = vector.extract_strided_slice %64 {offsets = [0, 64], sizes = [8, 32], strides = [1, 1]} : vector<8x96xf32> to vector<8x32xf32>
    %70 = arith.mulf %68, %32 : vector<8x32xf32>
    %71 = arith.mulf %67, %66 : vector<8x32xf32>
    %72 = arith.addf %70, %71 : vector<8x32xf32>
    %73 = math.tanh %72 : vector<8x32xf32>
    %74 = arith.mulf %69, %73 : vector<8x32xf32>
    %cst_22 = arith.constant dense<0.000000e+00> : vector<8x128xf32>
    %75 = tpu.matmul %74, %1, %cst_22 {dimension_numbers = #tpu.dot_dimension_numbers<[1], [0], [0], [1], [0, 0, 1, 1], [], []>} : vector<8x32xf32>, vector<32x128xf32>, vector<8x128xf32> -> vector<8x128xf32>
    %cst_23 = arith.constant dense<0.000000e+00> : vector<8x128xf32>
    %76 = tpu.matmul %54, %2, %cst_23 {dimension_numbers = #tpu.dot_dimension_numbers<[1], [0], [0], [1], [0, 0, 1, 1], [], []>} : vector<8x32xf32>, vector<32x128xf32>, vector<8x128xf32> -> vector<8x128xf32>
    %77 = arith.addf %75, %76 : vector<8x128xf32>
    %78 = arith.addf %77, %5 : vector<8x128xf32>
    %79 = vector.extract_strided_slice %78 {offsets = [0, 0], sizes = [8, 96], strides = [1, 1]} : vector<8x128xf32> to vector<8x96xf32>
    %80 = arith.negf %79 : vector<8x96xf32>
    %81 = math.exp %80 : vector<8x96xf32>
    %cst_24 = arith.constant 1.000000e+00 : f32
    %82 = vector.broadcast %cst_24 : f32 to vector<8x96xf32>
    %83 = arith.addf %82, %81 : vector<8x96xf32>
    %84 = arith.divf %82, %83 : vector<8x96xf32>
    %85 = vector.extract_strided_slice %78 {offsets = [0, 96], sizes = [8, 32], strides = [1, 1]} : vector<8x128xf32> to vector<8x32xf32>
    %86 = math.tanh %85 : vector<8x32xf32>
    %87 = vector.extract_strided_slice %84 {offsets = [0, 0], sizes = [8, 32], strides = [1, 1]} : vector<8x96xf32> to vector<8x32xf32>
    %88 = vector.extract_strided_slice %84 {offsets = [0, 32], sizes = [8, 32], strides = [1, 1]} : vector<8x96xf32> to vector<8x32xf32>
    %89 = vector.extract_strided_slice %84 {offsets = [0, 64], sizes = [8, 32], strides = [1, 1]} : vector<8x96xf32> to vector<8x32xf32>
    %90 = arith.mulf %88, %52 : vector<8x32xf32>
    %91 = arith.mulf %87, %86 : vector<8x32xf32>
    %92 = arith.addf %90, %91 : vector<8x32xf32>
    %93 = math.tanh %92 : vector<8x32xf32>
    %94 = arith.mulf %89, %93 : vector<8x32xf32>
    %95 = vector.extract_strided_slice %13 {offsets = [2, 0, 0], sizes = [1, 8, 128], strides = [1, 1, 1]} : vector<8x8x128xf32> to vector<1x8x128xf32>
    %96 = vector.shape_cast %95 : vector<1x8x128xf32> to vector<8x128xf32>
    %cst_25 = arith.constant dense<0.000000e+00> : vector<8x128xf32>
    %97 = tpu.matmul %74, %0, %cst_25 {dimension_numbers = #tpu.dot_dimension_numbers<[1], [0], [0], [1], [0, 0, 1, 1], [], []>} : vector<8x32xf32>, vector<32x128xf32>, vector<8x128xf32> -> vector<8x128xf32>
    %98 = arith.addf %96, %97 : vector<8x128xf32>
    %99 = vector.extract_strided_slice %98 {offsets = [0, 0], sizes = [8, 96], strides = [1, 1]} : vector<8x128xf32> to vector<8x96xf32>
    %100 = arith.negf %99 : vector<8x96xf32>
    %101 = math.exp %100 : vector<8x96xf32>
    %cst_26 = arith.constant 1.000000e+00 : f32
    %102 = vector.broadcast %cst_26 : f32 to vector<8x96xf32>
    %103 = arith.addf %102, %101 : vector<8x96xf32>
    %104 = arith.divf %102, %103 : vector<8x96xf32>
    %105 = vector.extract_strided_slice %98 {offsets = [0, 96], sizes = [8, 32], strides = [1, 1]} : vector<8x128xf32> to vector<8x32xf32>
    %106 = math.tanh %105 : vector<8x32xf32>
    %107 = vector.extract_strided_slice %104 {offsets = [0, 0], sizes = [8, 32], strides = [1, 1]} : vector<8x96xf32> to vector<8x32xf32>
    %108 = vector.extract_strided_slice %104 {offsets = [0, 32], sizes = [8, 32], strides = [1, 1]} : vector<8x96xf32> to vector<8x32xf32>
    %109 = vector.extract_strided_slice %104 {offsets = [0, 64], sizes = [8, 32], strides = [1, 1]} : vector<8x96xf32> to vector<8x32xf32>
    %110 = arith.mulf %108, %72 : vector<8x32xf32>
    %111 = arith.mulf %107, %106 : vector<8x32xf32>
    %112 = arith.addf %110, %111 : vector<8x32xf32>
    %113 = math.tanh %112 : vector<8x32xf32>
    %114 = arith.mulf %109, %113 : vector<8x32xf32>
    %cst_27 = arith.constant dense<0.000000e+00> : vector<8x128xf32>
    %115 = tpu.matmul %114, %1, %cst_27 {dimension_numbers = #tpu.dot_dimension_numbers<[1], [0], [0], [1], [0, 0, 1, 1], [], []>} : vector<8x32xf32>, vector<32x128xf32>, vector<8x128xf32> -> vector<8x128xf32>
    %cst_28 = arith.constant dense<0.000000e+00> : vector<8x128xf32>
    %116 = tpu.matmul %94, %2, %cst_28 {dimension_numbers = #tpu.dot_dimension_numbers<[1], [0], [0], [1], [0, 0, 1, 1], [], []>} : vector<8x32xf32>, vector<32x128xf32>, vector<8x128xf32> -> vector<8x128xf32>
    %117 = arith.addf %115, %116 : vector<8x128xf32>
    %118 = arith.addf %117, %5 : vector<8x128xf32>
    %119 = vector.extract_strided_slice %118 {offsets = [0, 0], sizes = [8, 96], strides = [1, 1]} : vector<8x128xf32> to vector<8x96xf32>
    %120 = arith.negf %119 : vector<8x96xf32>
    %121 = math.exp %120 : vector<8x96xf32>
    %cst_29 = arith.constant 1.000000e+00 : f32
    %122 = vector.broadcast %cst_29 : f32 to vector<8x96xf32>
    %123 = arith.addf %122, %121 : vector<8x96xf32>
    %124 = arith.divf %122, %123 : vector<8x96xf32>
    %125 = vector.extract_strided_slice %118 {offsets = [0, 96], sizes = [8, 32], strides = [1, 1]} : vector<8x128xf32> to vector<8x32xf32>
    %126 = math.tanh %125 : vector<8x32xf32>
    %127 = vector.extract_strided_slice %124 {offsets = [0, 0], sizes = [8, 32], strides = [1, 1]} : vector<8x96xf32> to vector<8x32xf32>
    %128 = vector.extract_strided_slice %124 {offsets = [0, 32], sizes = [8, 32], strides = [1, 1]} : vector<8x96xf32> to vector<8x32xf32>
    %129 = vector.extract_strided_slice %124 {offsets = [0, 64], sizes = [8, 32], strides = [1, 1]} : vector<8x96xf32> to vector<8x32xf32>
    %130 = arith.mulf %128, %92 : vector<8x32xf32>
    %131 = arith.mulf %127, %126 : vector<8x32xf32>
    %132 = arith.addf %130, %131 : vector<8x32xf32>
    %133 = math.tanh %132 : vector<8x32xf32>
    %134 = arith.mulf %129, %133 : vector<8x32xf32>
    %135 = vector.extract_strided_slice %13 {offsets = [3, 0, 0], sizes = [1, 8, 128], strides = [1, 1, 1]} : vector<8x8x128xf32> to vector<1x8x128xf32>
    %136 = vector.shape_cast %135 : vector<1x8x128xf32> to vector<8x128xf32>
    %cst_30 = arith.constant dense<0.000000e+00> : vector<8x128xf32>
    %137 = tpu.matmul %114, %0, %cst_30 {dimension_numbers = #tpu.dot_dimension_numbers<[1], [0], [0], [1], [0, 0, 1, 1], [], []>} : vector<8x32xf32>, vector<32x128xf32>, vector<8x128xf32> -> vector<8x128xf32>
    %138 = arith.addf %136, %137 : vector<8x128xf32>
    %139 = vector.extract_strided_slice %138 {offsets = [0, 0], sizes = [8, 96], strides = [1, 1]} : vector<8x128xf32> to vector<8x96xf32>
    %140 = arith.negf %139 : vector<8x96xf32>
    %141 = math.exp %140 : vector<8x96xf32>
    %cst_31 = arith.constant 1.000000e+00 : f32
    %142 = vector.broadcast %cst_31 : f32 to vector<8x96xf32>
    %143 = arith.addf %142, %141 : vector<8x96xf32>
    %144 = arith.divf %142, %143 : vector<8x96xf32>
    %145 = vector.extract_strided_slice %138 {offsets = [0, 96], sizes = [8, 32], strides = [1, 1]} : vector<8x128xf32> to vector<8x32xf32>
    %146 = math.tanh %145 : vector<8x32xf32>
    %147 = vector.extract_strided_slice %144 {offsets = [0, 0], sizes = [8, 32], strides = [1, 1]} : vector<8x96xf32> to vector<8x32xf32>
    %148 = vector.extract_strided_slice %144 {offsets = [0, 32], sizes = [8, 32], strides = [1, 1]} : vector<8x96xf32> to vector<8x32xf32>
    %149 = vector.extract_strided_slice %144 {offsets = [0, 64], sizes = [8, 32], strides = [1, 1]} : vector<8x96xf32> to vector<8x32xf32>
    %150 = arith.mulf %148, %112 : vector<8x32xf32>
    %151 = arith.mulf %147, %146 : vector<8x32xf32>
    %152 = arith.addf %150, %151 : vector<8x32xf32>
    %153 = math.tanh %152 : vector<8x32xf32>
    %154 = arith.mulf %149, %153 : vector<8x32xf32>
    %cst_32 = arith.constant dense<0.000000e+00> : vector<8x128xf32>
    %155 = tpu.matmul %154, %1, %cst_32 {dimension_numbers = #tpu.dot_dimension_numbers<[1], [0], [0], [1], [0, 0, 1, 1], [], []>} : vector<8x32xf32>, vector<32x128xf32>, vector<8x128xf32> -> vector<8x128xf32>
    %cst_33 = arith.constant dense<0.000000e+00> : vector<8x128xf32>
    %156 = tpu.matmul %134, %2, %cst_33 {dimension_numbers = #tpu.dot_dimension_numbers<[1], [0], [0], [1], [0, 0, 1, 1], [], []>} : vector<8x32xf32>, vector<32x128xf32>, vector<8x128xf32> -> vector<8x128xf32>
    %157 = arith.addf %155, %156 : vector<8x128xf32>
    %158 = arith.addf %157, %5 : vector<8x128xf32>
    %159 = vector.extract_strided_slice %158 {offsets = [0, 0], sizes = [8, 96], strides = [1, 1]} : vector<8x128xf32> to vector<8x96xf32>
    %160 = arith.negf %159 : vector<8x96xf32>
    %161 = math.exp %160 : vector<8x96xf32>
    %cst_34 = arith.constant 1.000000e+00 : f32
    %162 = vector.broadcast %cst_34 : f32 to vector<8x96xf32>
    %163 = arith.addf %162, %161 : vector<8x96xf32>
    %164 = arith.divf %162, %163 : vector<8x96xf32>
    %165 = vector.extract_strided_slice %158 {offsets = [0, 96], sizes = [8, 32], strides = [1, 1]} : vector<8x128xf32> to vector<8x32xf32>
    %166 = math.tanh %165 : vector<8x32xf32>
    %167 = vector.extract_strided_slice %164 {offsets = [0, 0], sizes = [8, 32], strides = [1, 1]} : vector<8x96xf32> to vector<8x32xf32>
    %168 = vector.extract_strided_slice %164 {offsets = [0, 32], sizes = [8, 32], strides = [1, 1]} : vector<8x96xf32> to vector<8x32xf32>
    %169 = vector.extract_strided_slice %164 {offsets = [0, 64], sizes = [8, 32], strides = [1, 1]} : vector<8x96xf32> to vector<8x32xf32>
    %170 = arith.mulf %168, %132 : vector<8x32xf32>
    %171 = arith.mulf %167, %166 : vector<8x32xf32>
    %172 = arith.addf %170, %171 : vector<8x32xf32>
    %173 = math.tanh %172 : vector<8x32xf32>
    %174 = arith.mulf %169, %173 : vector<8x32xf32>
    %175 = vector.extract_strided_slice %13 {offsets = [4, 0, 0], sizes = [1, 8, 128], strides = [1, 1, 1]} : vector<8x8x128xf32> to vector<1x8x128xf32>
    %176 = vector.shape_cast %175 : vector<1x8x128xf32> to vector<8x128xf32>
    %cst_35 = arith.constant dense<0.000000e+00> : vector<8x128xf32>
    %177 = tpu.matmul %154, %0, %cst_35 {dimension_numbers = #tpu.dot_dimension_numbers<[1], [0], [0], [1], [0, 0, 1, 1], [], []>} : vector<8x32xf32>, vector<32x128xf32>, vector<8x128xf32> -> vector<8x128xf32>
    %178 = arith.addf %176, %177 : vector<8x128xf32>
    %179 = vector.extract_strided_slice %178 {offsets = [0, 0], sizes = [8, 96], strides = [1, 1]} : vector<8x128xf32> to vector<8x96xf32>
    %180 = arith.negf %179 : vector<8x96xf32>
    %181 = math.exp %180 : vector<8x96xf32>
    %cst_36 = arith.constant 1.000000e+00 : f32
    %182 = vector.broadcast %cst_36 : f32 to vector<8x96xf32>
    %183 = arith.addf %182, %181 : vector<8x96xf32>
    %184 = arith.divf %182, %183 : vector<8x96xf32>
    %185 = vector.extract_strided_slice %178 {offsets = [0, 96], sizes = [8, 32], strides = [1, 1]} : vector<8x128xf32> to vector<8x32xf32>
    %186 = math.tanh %185 : vector<8x32xf32>
    %187 = vector.extract_strided_slice %184 {offsets = [0, 0], sizes = [8, 32], strides = [1, 1]} : vector<8x96xf32> to vector<8x32xf32>
    %188 = vector.extract_strided_slice %184 {offsets = [0, 32], sizes = [8, 32], strides = [1, 1]} : vector<8x96xf32> to vector<8x32xf32>
    %189 = vector.extract_strided_slice %184 {offsets = [0, 64], sizes = [8, 32], strides = [1, 1]} : vector<8x96xf32> to vector<8x32xf32>
    %190 = arith.mulf %188, %152 : vector<8x32xf32>
    %191 = arith.mulf %187, %186 : vector<8x32xf32>
    %192 = arith.addf %190, %191 : vector<8x32xf32>
    %193 = math.tanh %192 : vector<8x32xf32>
    %194 = arith.mulf %189, %193 : vector<8x32xf32>
    %cst_37 = arith.constant dense<0.000000e+00> : vector<8x128xf32>
    %195 = tpu.matmul %194, %1, %cst_37 {dimension_numbers = #tpu.dot_dimension_numbers<[1], [0], [0], [1], [0, 0, 1, 1], [], []>} : vector<8x32xf32>, vector<32x128xf32>, vector<8x128xf32> -> vector<8x128xf32>
    %cst_38 = arith.constant dense<0.000000e+00> : vector<8x128xf32>
    %196 = tpu.matmul %174, %2, %cst_38 {dimension_numbers = #tpu.dot_dimension_numbers<[1], [0], [0], [1], [0, 0, 1, 1], [], []>} : vector<8x32xf32>, vector<32x128xf32>, vector<8x128xf32> -> vector<8x128xf32>
    %197 = arith.addf %195, %196 : vector<8x128xf32>
    %198 = arith.addf %197, %5 : vector<8x128xf32>
    %199 = vector.extract_strided_slice %198 {offsets = [0, 0], sizes = [8, 96], strides = [1, 1]} : vector<8x128xf32> to vector<8x96xf32>
    %200 = arith.negf %199 : vector<8x96xf32>
    %201 = math.exp %200 : vector<8x96xf32>
    %cst_39 = arith.constant 1.000000e+00 : f32
    %202 = vector.broadcast %cst_39 : f32 to vector<8x96xf32>
    %203 = arith.addf %202, %201 : vector<8x96xf32>
    %204 = arith.divf %202, %203 : vector<8x96xf32>
    %205 = vector.extract_strided_slice %198 {offsets = [0, 96], sizes = [8, 32], strides = [1, 1]} : vector<8x128xf32> to vector<8x32xf32>
    %206 = math.tanh %205 : vector<8x32xf32>
    %207 = vector.extract_strided_slice %204 {offsets = [0, 0], sizes = [8, 32], strides = [1, 1]} : vector<8x96xf32> to vector<8x32xf32>
    %208 = vector.extract_strided_slice %204 {offsets = [0, 32], sizes = [8, 32], strides = [1, 1]} : vector<8x96xf32> to vector<8x32xf32>
    %209 = vector.extract_strided_slice %204 {offsets = [0, 64], sizes = [8, 32], strides = [1, 1]} : vector<8x96xf32> to vector<8x32xf32>
    %210 = arith.mulf %208, %172 : vector<8x32xf32>
    %211 = arith.mulf %207, %206 : vector<8x32xf32>
    %212 = arith.addf %210, %211 : vector<8x32xf32>
    %213 = math.tanh %212 : vector<8x32xf32>
    %214 = arith.mulf %209, %213 : vector<8x32xf32>
    %215 = vector.extract_strided_slice %13 {offsets = [5, 0, 0], sizes = [1, 8, 128], strides = [1, 1, 1]} : vector<8x8x128xf32> to vector<1x8x128xf32>
    %216 = vector.shape_cast %215 : vector<1x8x128xf32> to vector<8x128xf32>
    %cst_40 = arith.constant dense<0.000000e+00> : vector<8x128xf32>
    %217 = tpu.matmul %194, %0, %cst_40 {dimension_numbers = #tpu.dot_dimension_numbers<[1], [0], [0], [1], [0, 0, 1, 1], [], []>} : vector<8x32xf32>, vector<32x128xf32>, vector<8x128xf32> -> vector<8x128xf32>
    %218 = arith.addf %216, %217 : vector<8x128xf32>
    %219 = vector.extract_strided_slice %218 {offsets = [0, 0], sizes = [8, 96], strides = [1, 1]} : vector<8x128xf32> to vector<8x96xf32>
    %220 = arith.negf %219 : vector<8x96xf32>
    %221 = math.exp %220 : vector<8x96xf32>
    %cst_41 = arith.constant 1.000000e+00 : f32
    %222 = vector.broadcast %cst_41 : f32 to vector<8x96xf32>
    %223 = arith.addf %222, %221 : vector<8x96xf32>
    %224 = arith.divf %222, %223 : vector<8x96xf32>
    %225 = vector.extract_strided_slice %218 {offsets = [0, 96], sizes = [8, 32], strides = [1, 1]} : vector<8x128xf32> to vector<8x32xf32>
    %226 = math.tanh %225 : vector<8x32xf32>
    %227 = vector.extract_strided_slice %224 {offsets = [0, 0], sizes = [8, 32], strides = [1, 1]} : vector<8x96xf32> to vector<8x32xf32>
    %228 = vector.extract_strided_slice %224 {offsets = [0, 32], sizes = [8, 32], strides = [1, 1]} : vector<8x96xf32> to vector<8x32xf32>
    %229 = vector.extract_strided_slice %224 {offsets = [0, 64], sizes = [8, 32], strides = [1, 1]} : vector<8x96xf32> to vector<8x32xf32>
    %230 = arith.mulf %228, %192 : vector<8x32xf32>
    %231 = arith.mulf %227, %226 : vector<8x32xf32>
    %232 = arith.addf %230, %231 : vector<8x32xf32>
    %233 = math.tanh %232 : vector<8x32xf32>
    %234 = arith.mulf %229, %233 : vector<8x32xf32>
    %cst_42 = arith.constant dense<0.000000e+00> : vector<8x128xf32>
    %235 = tpu.matmul %234, %1, %cst_42 {dimension_numbers = #tpu.dot_dimension_numbers<[1], [0], [0], [1], [0, 0, 1, 1], [], []>} : vector<8x32xf32>, vector<32x128xf32>, vector<8x128xf32> -> vector<8x128xf32>
    %cst_43 = arith.constant dense<0.000000e+00> : vector<8x128xf32>
    %236 = tpu.matmul %214, %2, %cst_43 {dimension_numbers = #tpu.dot_dimension_numbers<[1], [0], [0], [1], [0, 0, 1, 1], [], []>} : vector<8x32xf32>, vector<32x128xf32>, vector<8x128xf32> -> vector<8x128xf32>
    %237 = arith.addf %235, %236 : vector<8x128xf32>
    %238 = arith.addf %237, %5 : vector<8x128xf32>
    %239 = vector.extract_strided_slice %238 {offsets = [0, 0], sizes = [8, 96], strides = [1, 1]} : vector<8x128xf32> to vector<8x96xf32>
    %240 = arith.negf %239 : vector<8x96xf32>
    %241 = math.exp %240 : vector<8x96xf32>
    %cst_44 = arith.constant 1.000000e+00 : f32
    %242 = vector.broadcast %cst_44 : f32 to vector<8x96xf32>
    %243 = arith.addf %242, %241 : vector<8x96xf32>
    %244 = arith.divf %242, %243 : vector<8x96xf32>
    %245 = vector.extract_strided_slice %238 {offsets = [0, 96], sizes = [8, 32], strides = [1, 1]} : vector<8x128xf32> to vector<8x32xf32>
    %246 = math.tanh %245 : vector<8x32xf32>
    %247 = vector.extract_strided_slice %244 {offsets = [0, 0], sizes = [8, 32], strides = [1, 1]} : vector<8x96xf32> to vector<8x32xf32>
    %248 = vector.extract_strided_slice %244 {offsets = [0, 32], sizes = [8, 32], strides = [1, 1]} : vector<8x96xf32> to vector<8x32xf32>
    %249 = vector.extract_strided_slice %244 {offsets = [0, 64], sizes = [8, 32], strides = [1, 1]} : vector<8x96xf32> to vector<8x32xf32>
    %250 = arith.mulf %248, %212 : vector<8x32xf32>
    %251 = arith.mulf %247, %246 : vector<8x32xf32>
    %252 = arith.addf %250, %251 : vector<8x32xf32>
    %253 = math.tanh %252 : vector<8x32xf32>
    %254 = arith.mulf %249, %253 : vector<8x32xf32>
    %255 = vector.extract_strided_slice %13 {offsets = [6, 0, 0], sizes = [1, 8, 128], strides = [1, 1, 1]} : vector<8x8x128xf32> to vector<1x8x128xf32>
    %256 = vector.shape_cast %255 : vector<1x8x128xf32> to vector<8x128xf32>
    %cst_45 = arith.constant dense<0.000000e+00> : vector<8x128xf32>
    %257 = tpu.matmul %234, %0, %cst_45 {dimension_numbers = #tpu.dot_dimension_numbers<[1], [0], [0], [1], [0, 0, 1, 1], [], []>} : vector<8x32xf32>, vector<32x128xf32>, vector<8x128xf32> -> vector<8x128xf32>
    %258 = arith.addf %256, %257 : vector<8x128xf32>
    %259 = vector.extract_strided_slice %258 {offsets = [0, 0], sizes = [8, 96], strides = [1, 1]} : vector<8x128xf32> to vector<8x96xf32>
    %260 = arith.negf %259 : vector<8x96xf32>
    %261 = math.exp %260 : vector<8x96xf32>
    %cst_46 = arith.constant 1.000000e+00 : f32
    %262 = vector.broadcast %cst_46 : f32 to vector<8x96xf32>
    %263 = arith.addf %262, %261 : vector<8x96xf32>
    %264 = arith.divf %262, %263 : vector<8x96xf32>
    %265 = vector.extract_strided_slice %258 {offsets = [0, 96], sizes = [8, 32], strides = [1, 1]} : vector<8x128xf32> to vector<8x32xf32>
    %266 = math.tanh %265 : vector<8x32xf32>
    %267 = vector.extract_strided_slice %264 {offsets = [0, 0], sizes = [8, 32], strides = [1, 1]} : vector<8x96xf32> to vector<8x32xf32>
    %268 = vector.extract_strided_slice %264 {offsets = [0, 32], sizes = [8, 32], strides = [1, 1]} : vector<8x96xf32> to vector<8x32xf32>
    %269 = vector.extract_strided_slice %264 {offsets = [0, 64], sizes = [8, 32], strides = [1, 1]} : vector<8x96xf32> to vector<8x32xf32>
    %270 = arith.mulf %268, %232 : vector<8x32xf32>
    %271 = arith.mulf %267, %266 : vector<8x32xf32>
    %272 = arith.addf %270, %271 : vector<8x32xf32>
    %273 = math.tanh %272 : vector<8x32xf32>
    %274 = arith.mulf %269, %273 : vector<8x32xf32>
    %cst_47 = arith.constant dense<0.000000e+00> : vector<8x128xf32>
    %275 = tpu.matmul %274, %1, %cst_47 {dimension_numbers = #tpu.dot_dimension_numbers<[1], [0], [0], [1], [0, 0, 1, 1], [], []>} : vector<8x32xf32>, vector<32x128xf32>, vector<8x128xf32> -> vector<8x128xf32>
    %cst_48 = arith.constant dense<0.000000e+00> : vector<8x128xf32>
    %276 = tpu.matmul %254, %2, %cst_48 {dimension_numbers = #tpu.dot_dimension_numbers<[1], [0], [0], [1], [0, 0, 1, 1], [], []>} : vector<8x32xf32>, vector<32x128xf32>, vector<8x128xf32> -> vector<8x128xf32>
    %277 = arith.addf %275, %276 : vector<8x128xf32>
    %278 = arith.addf %277, %5 : vector<8x128xf32>
    %279 = vector.extract_strided_slice %278 {offsets = [0, 0], sizes = [8, 96], strides = [1, 1]} : vector<8x128xf32> to vector<8x96xf32>
    %280 = arith.negf %279 : vector<8x96xf32>
    %281 = math.exp %280 : vector<8x96xf32>
    %cst_49 = arith.constant 1.000000e+00 : f32
    %282 = vector.broadcast %cst_49 : f32 to vector<8x96xf32>
    %283 = arith.addf %282, %281 : vector<8x96xf32>
    %284 = arith.divf %282, %283 : vector<8x96xf32>
    %285 = vector.extract_strided_slice %278 {offsets = [0, 96], sizes = [8, 32], strides = [1, 1]} : vector<8x128xf32> to vector<8x32xf32>
    %286 = math.tanh %285 : vector<8x32xf32>
    %287 = vector.extract_strided_slice %284 {offsets = [0, 0], sizes = [8, 32], strides = [1, 1]} : vector<8x96xf32> to vector<8x32xf32>
    %288 = vector.extract_strided_slice %284 {offsets = [0, 32], sizes = [8, 32], strides = [1, 1]} : vector<8x96xf32> to vector<8x32xf32>
    %289 = vector.extract_strided_slice %284 {offsets = [0, 64], sizes = [8, 32], strides = [1, 1]} : vector<8x96xf32> to vector<8x32xf32>
    %290 = arith.mulf %288, %252 : vector<8x32xf32>
    %291 = arith.mulf %287, %286 : vector<8x32xf32>
    %292 = arith.addf %290, %291 : vector<8x32xf32>
    %293 = math.tanh %292 : vector<8x32xf32>
    %294 = arith.mulf %289, %293 : vector<8x32xf32>
    %295 = vector.extract_strided_slice %13 {offsets = [7, 0, 0], sizes = [1, 8, 128], strides = [1, 1, 1]} : vector<8x8x128xf32> to vector<1x8x128xf32>
    %296 = vector.shape_cast %295 : vector<1x8x128xf32> to vector<8x128xf32>
    %cst_50 = arith.constant dense<0.000000e+00> : vector<8x128xf32>
    %297 = tpu.matmul %274, %0, %cst_50 {dimension_numbers = #tpu.dot_dimension_numbers<[1], [0], [0], [1], [0, 0, 1, 1], [], []>} : vector<8x32xf32>, vector<32x128xf32>, vector<8x128xf32> -> vector<8x128xf32>
    %298 = arith.addf %296, %297 : vector<8x128xf32>
    %299 = vector.extract_strided_slice %298 {offsets = [0, 0], sizes = [8, 96], strides = [1, 1]} : vector<8x128xf32> to vector<8x96xf32>
    %300 = arith.negf %299 : vector<8x96xf32>
    %301 = math.exp %300 : vector<8x96xf32>
    %cst_51 = arith.constant 1.000000e+00 : f32
    %302 = vector.broadcast %cst_51 : f32 to vector<8x96xf32>
    %303 = arith.addf %302, %301 : vector<8x96xf32>
    %304 = arith.divf %302, %303 : vector<8x96xf32>
    %305 = vector.extract_strided_slice %298 {offsets = [0, 96], sizes = [8, 32], strides = [1, 1]} : vector<8x128xf32> to vector<8x32xf32>
    %306 = math.tanh %305 : vector<8x32xf32>
    %307 = vector.extract_strided_slice %304 {offsets = [0, 0], sizes = [8, 32], strides = [1, 1]} : vector<8x96xf32> to vector<8x32xf32>
    %308 = vector.extract_strided_slice %304 {offsets = [0, 32], sizes = [8, 32], strides = [1, 1]} : vector<8x96xf32> to vector<8x32xf32>
    %309 = vector.extract_strided_slice %304 {offsets = [0, 64], sizes = [8, 32], strides = [1, 1]} : vector<8x96xf32> to vector<8x32xf32>
    %310 = arith.mulf %308, %272 : vector<8x32xf32>
    %311 = arith.mulf %307, %306 : vector<8x32xf32>
    %312 = arith.addf %310, %311 : vector<8x32xf32>
    %313 = math.tanh %312 : vector<8x32xf32>
    %314 = arith.mulf %309, %313 : vector<8x32xf32>
    %cst_52 = arith.constant dense<0.000000e+00> : vector<8x128xf32>
    %315 = tpu.matmul %314, %1, %cst_52 {dimension_numbers = #tpu.dot_dimension_numbers<[1], [0], [0], [1], [0, 0, 1, 1], [], []>} : vector<8x32xf32>, vector<32x128xf32>, vector<8x128xf32> -> vector<8x128xf32>
    %cst_53 = arith.constant dense<0.000000e+00> : vector<8x128xf32>
    %316 = tpu.matmul %294, %2, %cst_53 {dimension_numbers = #tpu.dot_dimension_numbers<[1], [0], [0], [1], [0, 0, 1, 1], [], []>} : vector<8x32xf32>, vector<32x128xf32>, vector<8x128xf32> -> vector<8x128xf32>
    %317 = arith.addf %315, %316 : vector<8x128xf32>
    %318 = arith.addf %317, %5 : vector<8x128xf32>
    %319 = vector.extract_strided_slice %318 {offsets = [0, 0], sizes = [8, 96], strides = [1, 1]} : vector<8x128xf32> to vector<8x96xf32>
    %320 = arith.negf %319 : vector<8x96xf32>
    %321 = math.exp %320 : vector<8x96xf32>
    %cst_54 = arith.constant 1.000000e+00 : f32
    %322 = vector.broadcast %cst_54 : f32 to vector<8x96xf32>
    %323 = arith.addf %322, %321 : vector<8x96xf32>
    %324 = arith.divf %322, %323 : vector<8x96xf32>
    %325 = vector.extract_strided_slice %318 {offsets = [0, 96], sizes = [8, 32], strides = [1, 1]} : vector<8x128xf32> to vector<8x32xf32>
    %326 = math.tanh %325 : vector<8x32xf32>
    %327 = vector.extract_strided_slice %324 {offsets = [0, 0], sizes = [8, 32], strides = [1, 1]} : vector<8x96xf32> to vector<8x32xf32>
    %328 = vector.extract_strided_slice %324 {offsets = [0, 32], sizes = [8, 32], strides = [1, 1]} : vector<8x96xf32> to vector<8x32xf32>
    %329 = vector.extract_strided_slice %324 {offsets = [0, 64], sizes = [8, 32], strides = [1, 1]} : vector<8x96xf32> to vector<8x32xf32>
    %330 = arith.mulf %328, %292 : vector<8x32xf32>
    %331 = arith.mulf %327, %326 : vector<8x32xf32>
    %332 = arith.addf %330, %331 : vector<8x32xf32>
    %333 = math.tanh %332 : vector<8x32xf32>
    %334 = arith.mulf %329, %333 : vector<8x32xf32>
    %c0_55 = arith.constant 0 : index
    %c0_56 = arith.constant 0 : index
    %335 = vector.load %arg7[%c0_55, %c0_56] : memref<32x128xf32, #tpu.memory_space<vmem>>, vector<32x128xf32>
    %cst_57 = arith.constant dense<0.000000e+00> : vector<8x128xf32>
    %336 = tpu.matmul %334, %335, %cst_57 {dimension_numbers = #tpu.dot_dimension_numbers<[1], [0], [0], [1], [0, 0, 1, 1], [], []>} : vector<8x32xf32>, vector<32x128xf32>, vector<8x128xf32> -> vector<8x128xf32>
    %c0_58 = arith.constant 0 : index
    %c0_59 = arith.constant 0 : index
    %337 = vector.load %arg8[%c0_58, %c0_59] : memref<1x128xf32, #tpu.memory_space<vmem>>, vector<1x128xf32>
    %338 = vector.broadcast %337 : vector<1x128xf32> to vector<8x128xf32>
    %339 = arith.addf %336, %338 : vector<8x128xf32>
    %c0_60 = arith.constant 0 : index
    %c0_61 = arith.constant 0 : index
    %340 = vector.load %arg9[%c0_60, %c0_61] : memref<8x128xf32, #tpu.memory_space<vmem>>, vector<8x128xf32>
    tpu.vector_store %arg9[%c0_60, %c0_61], %339 {strides = array<i32>} : memref<8x128xf32, #tpu.memory_space<vmem>>, vector<8x128xf32>,
    return
  }
}

</mosaic_0001>

<bundles_post_ra>
// kernel: simple_lstm_forward.1
= control target key start
LH: loop header
LB: loop body
LE: loop exit
PB: predicated region body
PF: predicated region fallthrough
CT: control target
= control target key end

     0   :  { %v3070_v0 = vmov 0.0   ;;  %vm3071_vm0 = vmmov 0   ;;  %vm68_vm1 = vcmask 130048   ;;  %s3072_s26 = smov 32   ;;  %vm198_vm2 = vcmask 261120   ;;  %s3717_s1 = inlined_call_operand.vmem [shape: f32[16,128], index: 1, kind: input, shape index: {}]   ;;  %s3718_s3 = inlined_call_operand.vmem [shape: f32[32,128], index: 3, kind: input, shape index: {}]   ;;  %s3719_s0 = inlined_call_operand.vmem [shape: f32[8,8,16], index: 0, kind: input, shape index: {}]   ;;  %s3720_s2 = inlined_call_operand.vmem [shape: f32[1,128], index: 2, kind: input, shape index: {}]   ;;  %s3721_s4 = inlined_call_operand.vmem [shape: f32[32,128], index: 4, kind: input, shape index: {}]   ;;  %s3722_s5 = inlined_call_operand.vmem [shape: f32[32,128], index: 5, kind: input, shape index: {}]   ;;  %s3723_s6 = inlined_call_operand.vmem [shape: f32[1,128], index: 6, kind: input, shape index: {}]   ;;  %s3724_s7 = inlined_call_operand.vmem [shape: f32[32,128], index: 7, kind: input, shape index: {}]   ;;  %s3725_s8 = inlined_call_operand.vmem [shape: f32[1,128], index: 8, kind: input, shape index: {}]   ;;  %s3726_s9 = inlined_call_operand.vmem [shape: f32[8,128], index: 9, kind: output, shape index: {}]  }
   0x1   :  { %2649 = vmatprep.subr.mxu1 %v3070_v0  ;;  %v60_v1 = vld [vmem:[%s3717_s1 + $0x8] sm:$0xff]  ;;  %v3131_v2 = vld [vmem:[%s3718_s3 + $0x18] sm:$0xff]  ;;  %v59_v3 = vld [vmem:[%s3717_s1] sm:$0xff]  ;;  %2657 = vmatprep.mubr.msk.f32.mxu1 %vm3071_vm0, %v3070_v0 }
   0x2   :  { %2633 = vmatprep.subr.mxu0 %v60_v1  ;;  %2650 = vmatpush3.msra.mxu1 %v3131_v2  ;;  %v3142_v4 = vld [vmem:[%s3718_s3 + $0x10] sm:$0xff]  ;;  %v51_v5 = vld [vmem:[%s3719_s0] sm:$0xff]  ;;  %v52_v6 = vld [vmem:[%s3719_s0 + $0x8] sm:$0xff] }
   0x3   :  { %2634 = vmatpush3.msra.mxu0 %v60_v1  ;;  %2651 = vmatprep.subr.mxu1 %v3070_v0  ;;  %v3155_v7 = vld [vmem:[%s3718_s3 + $0x8] sm:$0xff]  ;;  %v3163_v8 = vld [vmem:[%s3718_s3] sm:$0xff]  ;;  %v53_v26 = vld [vmem:[%s3719_s0 + $0x10] sm:$0xff] }
   0x4   :  { %2635 = vmatprep.subr.mxu0 %v59_v3  ;;  %2652 = vmatpush3.msra.mxu1 %v3142_v4  ;;  %v3178_v10 = vld [vmem:[%s3720_s2] ss:$0 sm:$0xff]  ;;  %v54_v27 = vld [vmem:[%s3719_s0 + $0x18] sm:$0xff]  ;;  %v3206_v30 = vld [vmem:[%s3722_s5 + $0x10] sm:$0xff] }
   0x5   :  { %2636 = vmatpush3.msra.mxu0 %v59_v3  ;;  %2637 = vmatprep.mubr.msk.f32.mxu0 %vm68_vm1, %v51_v5  ;;  %v3195_v28 = vld [vmem:[%s3721_s4 + $0x18] sm:$0xff]  ;;  %v3213_v31 = vld [vmem:[%s3721_s4 + $0x10] sm:$0xff]  ;;  %v55_v32 = vld [vmem:[%s3719_s0 + $0x20] sm:$0xff] }
   0x6   :  { %2653 = vmatprep.subr.mxu1 %v3070_v0  ;;  %2638 = vmatmul.mubr.msk.f32.vlgmr.msra.gmra.mxu0 %vm68_vm1, %v52_v6  ;;  %v3201_v29 = vld [vmem:[%s3722_s5 + $0x18] sm:$0xff]  ;;  %v3223_v33 = vld [vmem:[%s3722_s5 + $0x8] sm:$0xff]  ;;  %v3235_v35 = vld [vmem:[%s3722_s5] sm:$0xff] }
   0x7   :  { %2654 = vmatpush3.msra.mxu1 %v3155_v7  ;;  %2671 = vmatprep.subr.mxu0 %v3070_v0  ;;  %v56_v34 = vld [vmem:[%s3719_s0 + $0x28] sm:$0xff]  ;;  %v57_v37 = vld [vmem:[%s3719_s0 + $0x30] sm:$0xff]  ;;  %v58_v38 = vld [vmem:[%s3719_s0 + $0x38] sm:$0xff]  ;;  %s3073_s0 = smov 64  }
   0x8   :  { %2655 = vmatprep.subr.mxu1 %v3070_v0  ;;  %2640 = vmatprep.mubr.msk.f32.mxu0 %vm68_vm1, %v53_v26  ;;  %v3242_v36 = vld [vmem:[%s3721_s4 + $0x8] sm:$0xff]  ;;  %v3263_v40 = vld [vmem:[%s3721_s4] sm:$0xff] }
   0x9   :  { %2656 = vmatpush3.msra.mxu1 %v3163_v8  ;;  %2672 = vmatpush3.msra.mxu0 %v3195_v28  ;;  %v3320_v53 = vld [vmem:[%s3723_s6] ss:$0 sm:$0xff] }
   0xa   :  { %2658 = vmatmul.mubr.f32.vlgmr.msra.gmra.mxu1 %v3070_v0  ;;  %2660 = vmatprep.subr.mxu1 %v3070_v0 }
   0xb   :  { %2668 = vmatprep.mubr.msk.f32.mxu1 %vm3071_vm0, %v3070_v0  ;;  %2661 = vmatpush3.msra.mxu1 %v3201_v29 }
   0xc   :  { %2641 = vmatmul.mubr.msk.f32.gmra.mxu0 %vm68_vm1, %v54_v27  ;;  %2662 = vmatprep.subr.mxu1 %v3070_v0 }
   0xd   :  { %2663 = vmatpush3.msra.mxu1 %v3206_v30  ;;  %2673 = vmatprep.subr.mxu0 %v3070_v0 }
   0xe   :  { %2664 = vmatprep.subr.mxu1 %v3070_v0  ;;  %2674 = vmatpush3.msra.mxu0 %v3213_v31 }
   0xf   :  { %2643 = vmatprep.mubr.msk.f32.mxu0 %vm68_vm1, %v55_v32  ;;  %2665 = vmatpush3.msra.mxu1 %v3223_v33 }
  0x10   :  { %2644 = vmatmul.mubr.msk.f32.gmra.mxu0 %vm68_vm1, %v56_v34  ;;  %2666 = vmatprep.subr.mxu1 %v3070_v0 }
  0x11   :  { %2667 = vmatpush3.msra.mxu1 %v3235_v35  ;;  %2675 = vmatprep.subr.mxu0 %v3070_v0 }
  0x12   :  { %2676 = vmatpush3.msra.mxu0 %v3242_v36  ;;  %2682 = vmatprep.subr.mxu1 %v3070_v0 }
  0x13   :  { %2646 = vmatprep.mubr.msk.f32.mxu0 %vm68_vm1, %v57_v37  ;;  %2669 = vmatmul.mubr.f32.vlgmr.msra.gmra.mxu1 %v3070_v0 }
  0x14   :  { %2683 = vmatpush3.msra.mxu1 %v3131_v2  ;;  %2647 = vmatmul.mubr.msk.f32.gmra.mxu0 %vm68_vm1, %v58_v38 }
  0x15   :  { %2684 = vmatprep.subr.mxu1 %v3070_v0  ;;  %2677 = vmatprep.subr.mxu0 %v3070_v0 }
  0x16   :  { %2685 = vmatpush3.msra.mxu1 %v3142_v4  ;;  %2678 = vmatpush3.msra.mxu0 %v3263_v40 }
  0x17   :  { %2686 = vmatprep.subr.mxu1 %v3070_v0  ;;  %2679 = vmatprep.mubr.msk.f32.mxu0 %vm3071_vm0, %v3070_v0 }
  0x18   :  { %2687 = vmatpush3.msra.mxu1 %v3155_v7  ;;  %2690 = vmatprep.mubr.msk.f32.mxu1 %vm3071_vm0, %v3070_v0 }
  0x19   :  { %2688 = vmatprep.subr.mxu1 %v3070_v0  ;;  %2693 = vmatprep.subr.mxu0 %v3070_v0 }
  0x1a   :  { %2689 = vmatpush3.msra.mxu1 %v3163_v8 }
  0x1b   :  { %2704 = vmatprep.subr.mxu1 %v3070_v0 }
  0xc6   :  { %v3173_v9 = vpop.f32.mrf.mxu0 }
  0xc7   :  { %v165_v52 = vadd.f32 %v3173_v9, %v3178_v10 }
  0xc8   :  { %v159_v11 = vpop.f32.mrf.mxu0 }
  0xc9   :  { %v160_v12 = vadd.f32 %v3178_v10, %v159_v11 }
  0xca   :  { %v268_v13 = vpop.f32.mrf.mxu1 }
  0xcb   :  { %v272_v14 = vadd.f32 %v268_v13, %v160_v12 }
  0xcc   :  { %v2659_v15 = vpop.f32.mrf.mxu1  ;;  %v3303_v46 = vpop.f32.mrf.mxu0 }
  0xcd   :  { %2928 = vtanh.f32 %v272_v14  ;;  %v2458_v17 = vmul.f32 -1.442695, %v272_v14 }
  0xce   :  { %v3305_v47 = vpop.f32.mrf.mxu0 }
  0xcf   :  { %2930 = vpow2.f32 %v2458_v17 }
  0xd0   :  { %v3307_v48 = vpop.f32.mrf.mxu0 }
  0xd2   :  { %v3309_v49 = vpop.f32.mrf.mxu0 }
  0xd3   :  { %v363_v43 = vpop.f32.mrf.mxu1 }
  0xd4   :  { %v3311_v50 = vpop.f32.mrf.mxu0 }
  0xd5   :  { %v2670_v44 = vpop.f32.mrf.mxu1 }
  0xd6   :  { %v3313_v51 = vpop.f32.mrf.mxu0 }
  0xda   :  { %v2929_v16 = vpop.eup %2928 }
  0xdb   :  { %282 = vrot.lane.b32.xlu0 %v2929_v16, %s3072_s26 }
  0xdc   :  { %v2931_v18 = vpop.eup %2930 }
  0xdd   :  { %v276_v19 = vadd.f32 1.0, %v2931_v18 }
  0xdf   :  { %2932 = vrcp.f32 %v276_v19 }
  0xec   :  { %v2933_v20 = vpop.eup %2932 }
  0xed   :  { %v280_v23 = vmul.f32 0.0, %v2933_v20 }
 0x14d   :  { %v283_v21 = vpop.permute.xlu0 %282 }
 0x14e   :  { %v285_v22 = vmul.f32 %v2933_v20, %v283_v21 }
 0x150   :  { %287 = vrot.lane.b32.xlu0 %v285_v22, %s3072_s26 }
 0x1c2   :  { %v288_v24 = vpop.permute.xlu0 %287 }
 0x1c3   :  { %v3183_v25 = vadd.f32 %v288_v24, %v280_v23 }
 0x1c5   :  { %2934 = vtanh.f32 %v3183_v25 }
 0x1d2   :  { %v2935_v39 = vpop.eup %2934 }
 0x1d3   :  { %293 = vrot.lane.b32.xlu1 %v2935_v39, %s3072_s26 }
 0x245   :  { %v294_v41 = vpop.permute.xlu1 %293 }
 0x246   :  { %v296_v42 = vmul.f32 %v2933_v20, %v294_v41 }
 0x248   :  { %368 = vrot.lane.b32.xlu1 %v296_v42, %s3073_s0 }
 0x2ba   :  { %v369_v45 = vpop.permute.xlu1 %368 }
 0x2bb   :  { %2680 = vmatmul.mubr.msk.f32.vlgmr.msra.gmra.mxu0 %vm198_vm2, %v369_v45  ;;  %2691 = vmatmul.mubr.msk.f32.vlgmr.msra.gmra.mxu1 %vm198_vm2, %v369_v45  ;;  %v170_v45 = vadd.f32 %v3178_v10, %v3305_v47 }
 0x2bc   :  { %2705 = vmatpush3.msra.mxu1 %v3195_v28  ;;  %2694 = vmatpush3.msra.mxu0 %v3201_v29 }
 0x2bd   :  { %2706 = vmatprep.subr.mxu1 %v3070_v0  ;;  %2695 = vmatprep.subr.mxu0 %v3070_v0 }
 0x2be   :  { %2707 = vmatpush3.msra.mxu1 %v3213_v31  ;;  %2696 = vmatpush3.msra.mxu0 %v3206_v30 }
 0x2bf   :  { %2708 = vmatprep.subr.mxu1 %v3070_v0  ;;  %2697 = vmatprep.subr.mxu0 %v3070_v0 }
 0x2c0   :  { %2709 = vmatpush3.msra.mxu1 %v3242_v36  ;;  %2698 = vmatpush3.msra.mxu0 %v3223_v33 }
 0x2c1   :  { %2710 = vmatprep.subr.mxu1 %v3070_v0  ;;  %2712 = vmatprep.mubr.msk.f32.mxu1 %vm3071_vm0, %v3070_v0 }
 0x2c2   :  { %2711 = vmatpush3.msra.mxu1 %v3263_v40  ;;  %2699 = vmatprep.subr.mxu0 %v3070_v0 }
 0x2c3   :  { %2700 = vmatpush3.msra.mxu0 %v3235_v35  ;;  %2701 = vmatprep.mubr.msk.f32.mxu0 %vm3071_vm0, %v3070_v0 }
 0x2c4   :  { %2715 = vmatprep.subr.mxu0 %v3070_v0  ;;  %2726 = vmatprep.subr.mxu1 %v3070_v0 }
 0x37b   :  { %v438_v54 = vpop.f32.mrf.mxu0  ;;  %v533_v55 = vpop.f32.mrf.mxu1 }
 0x37c   :  { %v439_v56 = vadd.f32 %v438_v54, %v363_v43  ;;  %v537_v57 = vadd.f32 %v533_v55, %v165_v52 }
 0x37d   :  { %v2681_v58 = vpop.f32.mrf.mxu0  ;;  %v2692_v59 = vpop.f32.mrf.mxu1 }
 0x37e   :  { %v442_v60 = vadd.f32 %v3320_v53, %v439_v56  ;;  %2936 = vtanh.f32 %v537_v57  ;;  %v2462_v63 = vmul.f32 -1.442695, %v537_v57 }
 0x380   :  { %2938 = vtanh.f32 %v442_v60  ;;  %v2460_v1 = vmul.f32 -1.442695, %v442_v60 }
 0x381   :  { %2940 = vpow2.f32 %v2462_v63 }
 0x382   :  { %2942 = vpow2.f32 %v2460_v1 }
 0x38b   :  { %v2937_v61 = vpop.eup %2936 }
 0x38c   :  { %547 = vrot.lane.b32.xlu1 %v2937_v61, %s3072_s26 }
 0x38d   :  { %v2939_v62 = vpop.eup %2938 }
 0x38e   :  { %452 = vrot.lane.b32.xlu0 %v2939_v62, %s3072_s26  ;;  %v2941_v3 = vpop.eup %2940 }
 0x38f   :  { %v2943_v5 = vpop.eup %2942  ;;  %v541_v6 = vadd.f32 1.0, %v2941_v3 }
 0x390   :  { %v446_v9 = vadd.f32 1.0, %v2943_v5 }
 0x391   :  { %2944 = vrcp.f32 %v541_v6 }
 0x392   :  { %2946 = vrcp.f32 %v446_v9 }
 0x39e   :  { %v2945_v11 = vpop.eup %2944 }
 0x39f   :  { %v2947_v14 = vpop.eup %2946  ;;  %v545_v17 = vmul.f32 %v2945_v11, %v3183_v25 }
 0x3a0   :  { %v450_v20 = vmul.f32 0.0, %v2947_v14 }
 0x3fe   :  { %v548_v12 = vpop.permute.xlu1 %547 }
 0x3ff   :  { %v550_v13 = vmul.f32 %v2945_v11, %v548_v12 }
 0x400   :  { %v453_v15 = vpop.permute.xlu0 %452 }
 0x401   :  { %v455_v16 = vmul.f32 %v2947_v14, %v453_v15  ;;  %552 = vrot.lane.b32.xlu1 %v550_v13, %s3072_s26 }
 0x403   :  { %457 = vrot.lane.b32.xlu0 %v455_v16, %s3072_s26 }
 0x473   :  { %v553_v18 = vpop.permute.xlu1 %552 }
 0x474   :  { %v3328_v19 = vadd.f32 %v553_v18, %v545_v17 }
 0x475   :  { %v458_v21 = vpop.permute.xlu0 %457 }
 0x476   :  { %2948 = vtanh.f32 %v3328_v19  ;;  %v3331_v22 = vadd.f32 %v458_v21, %v450_v20 }
 0x478   :  { %2950 = vtanh.f32 %v3331_v22 }
 0x483   :  { %v2949_v23 = vpop.eup %2948 }
 0x484   :  { %558 = vrot.lane.b32.xlu1 %v2949_v23, %s3072_s26 }
 0x485   :  { %v2951_v24 = vpop.eup %2950 }
 0x486   :  { %463 = vrot.lane.b32.xlu0 %v2951_v24, %s3072_s26 }
 0x4f6   :  { %v559_v26 = vpop.permute.xlu1 %558 }
 0x4f7   :  { %v561_v27 = vmul.f32 %v2945_v11, %v559_v26 }
 0x4f8   :  { %v464_v25 = vpop.permute.xlu0 %463 }
 0x4f9   :  { %v466_v32 = vmul.f32 %v2947_v14, %v464_v25  ;;  %638 = vrot.lane.b32.xlu1 %v561_v27, %s3073_s0 }
 0x4fb   :  { %563 = vrot.lane.b32.xlu0 %v466_v32, %s3073_s0  ;;  %v175_v32 = vadd.f32 %v3303_v46, %v3178_v10 }
 0x56b   :  { %v639_v34 = vpop.permute.xlu1 %638 }
 0x56c   :  { %2713 = vmatmul.mubr.msk.f32.vlgmr.msra.gmra.mxu1 %vm198_vm2, %v639_v34 }
 0x56d   :  { %v564_v37 = vpop.permute.xlu0 %563  ;;  %2727 = vmatpush3.msra.mxu1 %v3201_v29  ;;  %2734 = vmatprep.mubr.msk.f32.mxu1 %vm3071_vm0, %v3070_v0 }
 0x56e   :  { %2702 = vmatmul.mubr.msk.f32.vlgmr.msra.gmra.mxu0 %vm198_vm2, %v564_v37  ;;  %2728 = vmatprep.subr.mxu1 %v3070_v0 }
 0x56f   :  { %2716 = vmatpush3.msra.mxu0 %v3131_v2  ;;  %2723 = vmatprep.mubr.msk.f32.mxu0 %vm3071_vm0, %v3070_v0 }
 0x570   :  { %2717 = vmatprep.subr.mxu0 %v3070_v0  ;;  %2729 = vmatpush3.msra.mxu1 %v3206_v30 }
 0x571   :  { %2718 = vmatpush3.msra.mxu0 %v3142_v4  ;;  %2730 = vmatprep.subr.mxu1 %v3070_v0 }
 0x572   :  { %2719 = vmatprep.subr.mxu0 %v3070_v0  ;;  %2731 = vmatpush3.msra.mxu1 %v3223_v33 }
 0x573   :  { %2720 = vmatpush3.msra.mxu0 %v3155_v7  ;;  %2732 = vmatprep.subr.mxu1 %v3070_v0 }
 0x574   :  { %2721 = vmatprep.subr.mxu0 %v3070_v0  ;;  %2733 = vmatpush3.msra.mxu1 %v3235_v35 }
 0x575   :  { %2722 = vmatpush3.msra.mxu0 %v3163_v8  ;;  %2748 = vmatprep.subr.mxu1 %v3070_v0 }
 0x576   :  { %2724 = vmatmul.mubr.msk.f32.vlgmr.msra.gmra.mxu0 %vm198_vm2, %v639_v34  ;;  %2737 = vmatprep.subr.mxu0 %v3070_v0 }
 0x577   :  { %2738 = vmatpush3.msra.mxu0 %v3195_v28  ;;  %2745 = vmatprep.mubr.msk.f32.mxu0 %vm3071_vm0, %v3070_v0 }
 0x578   :  { %2739 = vmatprep.subr.mxu0 %v3070_v0 }
 0x579   :  { %2740 = vmatpush3.msra.mxu0 %v3213_v31 }
 0x57a   :  { %2741 = vmatprep.subr.mxu0 %v3070_v0 }
 0x57b   :  { %2742 = vmatpush3.msra.mxu0 %v3242_v36 }
 0x57c   :  { %2743 = vmatprep.subr.mxu0 %v3070_v0 }
 0x57d   :  { %2744 = vmatpush3.msra.mxu0 %v3263_v40 }
 0x57e   :  { %2759 = vmatprep.subr.mxu0 %v3070_v0 }
 0x62c   :  { %v708_v38 = vpop.f32.mrf.mxu1 }
 0x62e   :  { %v633_v39 = vpop.f32.mrf.mxu0  ;;  %v2714_v41 = vpop.f32.mrf.mxu1 }
 0x62f   :  { %v709_v42 = vadd.f32 %v708_v38, %v633_v39 }
 0x630   :  { %v2703_v43 = vpop.f32.mrf.mxu0 }
 0x631   :  { %v712_v44 = vadd.f32 %v3320_v53, %v709_v42 }
 0x633   :  { %2952 = vtanh.f32 %v712_v44  ;;  %v2465_v58 = vmul.f32 -1.442695, %v712_v44 }
 0x636   :  { %v803_v52 = vpop.f32.mrf.mxu0 }
 0x637   :  { %v807_v54 = vadd.f32 %v803_v52, %v170_v45 }
 0x638   :  { %v2725_v55 = vpop.f32.mrf.mxu0 }
 0x639   :  { %2954 = vtanh.f32 %v807_v54  ;;  %v2467_v59 = vmul.f32 -1.442695, %v807_v54 }
 0x63a   :  { %2956 = vpow2.f32 %v2465_v58 }
 0x63b   :  { %2958 = vpow2.f32 %v2467_v59 }
 0x640   :  { %v2953_v56 = vpop.eup %2952 }
 0x641   :  { %722 = vrot.lane.b32.xlu0 %v2953_v56, %s3072_s26 }
 0x646   :  { %v2955_v57 = vpop.eup %2954 }
 0x647   :  { %817 = vrot.lane.b32.xlu1 %v2955_v57, %s3072_s26  ;;  %v2957_v60 = vpop.eup %2956 }
 0x648   :  { %v716_v61 = vadd.f32 1.0, %v2957_v60  ;;  %v2959_v62 = vpop.eup %2958 }
 0x649   :  { %v811_v63 = vadd.f32 1.0, %v2959_v62 }
 0x64a   :  { %2960 = vrcp.f32 %v716_v61 }
 0x64b   :  { %2962 = vrcp.f32 %v811_v63 }
 0x657   :  { %v2961_v47 = vpop.eup %2960 }
 0x658   :  { %v2963_v5 = vpop.eup %2962  ;;  %v720_v11 = vmul.f32 %v2961_v47, %v3331_v22 }
 0x659   :  { %v815_v14 = vmul.f32 %v2963_v5, %v3328_v19 }
 0x6b3   :  { %v723_v1 = vpop.permute.xlu0 %722 }
 0x6b4   :  { %v725_v3 = vmul.f32 %v2961_v47, %v723_v1 }
 0x6b6   :  { %727 = vrot.lane.b32.xlu0 %v725_v3, %s3072_s26 }
 0x6b9   :  { %v818_v6 = vpop.permute.xlu1 %817 }
 0x6ba   :  { %v820_v9 = vmul.f32 %v2963_v5, %v818_v6 }
 0x6bc   :  { %822 = vrot.lane.b32.xlu1 %v820_v9, %s3072_s26 }
 0x728   :  { %v728_v12 = vpop.permute.xlu0 %727 }
 0x729   :  { %v3379_v13 = vadd.f32 %v728_v12, %v720_v11 }
 0x72b   :  { %2964 = vtanh.f32 %v3379_v13 }
 0x72e   :  { %v823_v15 = vpop.permute.xlu1 %822 }
 0x72f   :  { %v3383_v16 = vadd.f32 %v823_v15, %v815_v14 }
 0x731   :  { %2966 = vtanh.f32 %v3383_v16 }
 0x738   :  { %v2965_v17 = vpop.eup %2964 }
 0x739   :  { %733 = vrot.lane.b32.xlu0 %v2965_v17, %s3072_s26 }
 0x73e   :  { %v2967_v18 = vpop.eup %2966 }
 0x73f   :  { %828 = vrot.lane.b32.xlu1 %v2967_v18, %s3072_s26 }
 0x7ab   :  { %v734_v20 = vpop.permute.xlu0 %733 }
 0x7ac   :  { %v736_v21 = vmul.f32 %v2961_v47, %v734_v20 }
 0x7ae   :  { %833 = vrot.lane.b32.xlu0 %v736_v21, %s3073_s0 }
 0x7b1   :  { %v829_v22 = vpop.permute.xlu1 %828 }
 0x7b2   :  { %v831_v23 = vmul.f32 %v2963_v5, %v829_v22 }
 0x7b4   :  { %908 = vrot.lane.b32.xlu1 %v831_v23, %s3073_s0 }
 0x820   :  { %v834_v19 = vpop.permute.xlu0 %833 }
 0x821   :  { %2735 = vmatmul.mubr.msk.f32.vlgmr.msra.gmra.mxu1 %vm198_vm2, %v834_v19 }
 0x822   :  { %2749 = vmatpush3.msra.mxu1 %v3131_v2  ;;  %2756 = vmatprep.mubr.msk.f32.mxu1 %vm3071_vm0, %v3070_v0 }
 0x823   :  { %2750 = vmatprep.subr.mxu1 %v3070_v0 }
 0x824   :  { %2751 = vmatpush3.msra.mxu1 %v3142_v4 }
 0x825   :  { %2752 = vmatprep.subr.mxu1 %v3070_v0 }
 0x826   :  { %2753 = vmatpush3.msra.mxu1 %v3155_v7  ;;  %v909_v24 = vpop.permute.xlu1 %908 }
 0x827   :  { %2746 = vmatmul.mubr.msk.f32.vlgmr.msra.gmra.mxu0 %vm198_vm2, %v909_v24  ;;  %2754 = vmatprep.subr.mxu1 %v3070_v0 }
 0x828   :  { %2755 = vmatpush3.msra.mxu1 %v3163_v8  ;;  %2760 = vmatpush3.msra.mxu0 %v3201_v29 }
 0x829   :  { %2757 = vmatmul.mubr.msk.f32.vlgmr.msra.gmra.mxu1 %vm198_vm2, %v909_v24  ;;  %2770 = vmatprep.subr.mxu1 %v3070_v0  ;;  %v180_v24 = vadd.f32 %v3178_v10, %v3309_v49 }
 0x82a   :  { %2761 = vmatprep.subr.mxu0 %v3070_v0  ;;  %2771 = vmatpush3.msra.mxu1 %v3195_v28 }
 0x82b   :  { %2762 = vmatpush3.msra.mxu0 %v3206_v30  ;;  %2772 = vmatprep.subr.mxu1 %v3070_v0 }
 0x82c   :  { %2763 = vmatprep.subr.mxu0 %v3070_v0  ;;  %2773 = vmatpush3.msra.mxu1 %v3213_v31 }
 0x82d   :  { %2764 = vmatpush3.msra.mxu0 %v3223_v33  ;;  %2774 = vmatprep.subr.mxu1 %v3070_v0 }
 0x82e   :  { %2765 = vmatprep.subr.mxu0 %v3070_v0  ;;  %2775 = vmatpush3.msra.mxu1 %v3242_v36 }
 0x82f   :  { %2766 = vmatpush3.msra.mxu0 %v3235_v35  ;;  %2776 = vmatprep.subr.mxu1 %v3070_v0 }
 0x830   :  { %2777 = vmatpush3.msra.mxu1 %v3263_v40  ;;  %2778 = vmatprep.mubr.msk.f32.mxu1 %vm3071_vm0, %v3070_v0 }
 0x831   :  { %2767 = vmatprep.mubr.msk.f32.mxu0 %vm3071_vm0, %v3070_v0  ;;  %2781 = vmatprep.subr.mxu0 %v3070_v0 }
 0x832   :  { %2792 = vmatprep.subr.mxu1 %v3070_v0 }
 0x8e1   :  { %v903_v26 = vpop.f32.mrf.mxu1 }
 0x8e3   :  { %v2736_v27 = vpop.f32.mrf.mxu1 }
 0x8e7   :  { %v978_v25 = vpop.f32.mrf.mxu0 }
 0x8e8   :  { %v979_v34 = vadd.f32 %v978_v25, %v903_v26 }
 0x8e9   :  { %v2747_v37 = vpop.f32.mrf.mxu0  ;;  %v1073_v38 = vpop.f32.mrf.mxu1 }
 0x8ea   :  { %v982_v39 = vadd.f32 %v3320_v53, %v979_v34  ;;  %v1077_v41 = vadd.f32 %v1073_v38, %v175_v32 }
 0x8eb   :  { %v2758_v42 = vpop.f32.mrf.mxu1 }
 0x8ec   :  { %2968 = vtanh.f32 %v982_v39  ;;  %v2470_v45 = vmul.f32 -1.442695, %v982_v39  ;;  %v2472_v52 = vmul.f32 -1.442695, %v1077_v41 }
 0x8ed   :  { %2970 = vtanh.f32 %v1077_v41 }
 0x8ee   :  { %2972 = vpow2.f32 %v2470_v45 }
 0x8ef   :  { %2974 = vpow2.f32 %v2472_v52 }
 0x8f9   :  { %v2969_v43 = vpop.eup %2968 }
 0x8fa   :  { %v2971_v44 = vpop.eup %2970  ;;  %992 = vrot.lane.b32.xlu0 %v2969_v43, %s3072_s26 }
 0x8fb   :  { %1087 = vrot.lane.b32.xlu1 %v2971_v44, %s3072_s26  ;;  %v2973_v46 = vpop.eup %2972 }
 0x8fc   :  { %v2975_v54 = vpop.eup %2974  ;;  %v986_v55 = vadd.f32 1.0, %v2973_v46 }
 0x8fd   :  { %v1081_v56 = vadd.f32 1.0, %v2975_v54 }
 0x8fe   :  { %2976 = vrcp.f32 %v986_v55 }
 0x8ff   :  { %2978 = vrcp.f32 %v1081_v56 }
 0x90b   :  { %v2977_v57 = vpop.eup %2976 }
 0x90c   :  { %v2979_v59 = vpop.eup %2978  ;;  %v990_v63 = vmul.f32 %v2977_v57, %v3379_v13 }
 0x90d   :  { %v1085_v47 = vmul.f32 %v2979_v59, %v3383_v16 }
 0x96c   :  { %v993_v58 = vpop.permute.xlu0 %992 }
 0x96d   :  { %v1088_v60 = vpop.permute.xlu1 %1087  ;;  %v995_v61 = vmul.f32 %v2977_v57, %v993_v58 }
 0x96e   :  { %v1090_v62 = vmul.f32 %v2979_v59, %v1088_v60 }
 0x96f   :  { %997 = vrot.lane.b32.xlu0 %v995_v61, %s3072_s26 }
 0x970   :  { %1092 = vrot.lane.b32.xlu1 %v1090_v62, %s3072_s26 }
 0x9e1   :  { %v998_v1 = vpop.permute.xlu0 %997 }
 0x9e2   :  { %v1093_v3 = vpop.permute.xlu1 %1092  ;;  %v3432_v5 = vadd.f32 %v998_v1, %v990_v63 }
 0x9e3   :  { %v3434_v6 = vadd.f32 %v1093_v3, %v1085_v47 }
 0x9e4   :  { %2980 = vtanh.f32 %v3432_v5 }
 0x9e5   :  { %2982 = vtanh.f32 %v3434_v6 }
 0x9f1   :  { %v2981_v9 = vpop.eup %2980 }
 0x9f2   :  { %v2983_v11 = vpop.eup %2982  ;;  %1003 = vrot.lane.b32.xlu0 %v2981_v9, %s3072_s26  ;;  %v185_v9 = vadd.f32 %v3307_v48, %v3178_v10 }
 0x9f3   :  { %1098 = vrot.lane.b32.xlu1 %v2983_v11, %s3072_s26 }
 0xa64   :  { %v1004_v12 = vpop.permute.xlu0 %1003 }
 0xa65   :  { %v1099_v13 = vpop.permute.xlu1 %1098  ;;  %v1006_v14 = vmul.f32 %v2977_v57, %v1004_v12 }
 0xa66   :  { %v1101_v15 = vmul.f32 %v2979_v59, %v1099_v13 }
 0xa67   :  { %1103 = vrot.lane.b32.xlu0 %v1006_v14, %s3073_s0 }
 0xa68   :  { %1178 = vrot.lane.b32.xlu1 %v1101_v15, %s3073_s0 }
 0xad9   :  { %v1104_v16 = vpop.permute.xlu0 %1103 }
 0xada   :  { %v1179_v17 = vpop.permute.xlu1 %1178  ;;  %2768 = vmatmul.mubr.msk.f32.vlgmr.msra.gmra.mxu0 %vm198_vm2, %v1104_v16 }
 0xadb   :  { %2779 = vmatmul.mubr.msk.f32.vlgmr.msra.gmra.mxu1 %vm198_vm2, %v1179_v17  ;;  %2782 = vmatpush3.msra.mxu0 %v3131_v2 }
 0xadc   :  { %2783 = vmatprep.subr.mxu0 %v3070_v0  ;;  %2789 = vmatprep.mubr.msk.f32.mxu0 %vm3071_vm0, %v3070_v0 }
 0xadd   :  { %2784 = vmatpush3.msra.mxu0 %v3142_v4  ;;  %2793 = vmatpush3.msra.mxu1 %v3201_v29 }
 0xade   :  { %2785 = vmatprep.subr.mxu0 %v3070_v0  ;;  %2794 = vmatprep.subr.mxu1 %v3070_v0 }
 0xadf   :  { %2786 = vmatpush3.msra.mxu0 %v3155_v7  ;;  %2795 = vmatpush3.msra.mxu1 %v3206_v30 }
 0xae0   :  { %2787 = vmatprep.subr.mxu0 %v3070_v0  ;;  %2796 = vmatprep.subr.mxu1 %v3070_v0 }
 0xae1   :  { %2788 = vmatpush3.msra.mxu0 %v3163_v8  ;;  %2797 = vmatpush3.msra.mxu1 %v3223_v33 }
 0xae2   :  { %2790 = vmatmul.mubr.msk.f32.vlgmr.msra.gmra.mxu0 %vm198_vm2, %v1179_v17  ;;  %2798 = vmatprep.subr.mxu1 %v3070_v0 }
 0xae3   :  { %2803 = vmatprep.subr.mxu0 %v3070_v0  ;;  %2799 = vmatpush3.msra.mxu1 %v3235_v35 }
 0xae4   :  { %2804 = vmatpush3.msra.mxu0 %v3195_v28  ;;  %2800 = vmatprep.mubr.msk.f32.mxu1 %vm3071_vm0, %v3070_v0 }
 0xae5   :  { %2805 = vmatprep.subr.mxu0 %v3070_v0  ;;  %2814 = vmatprep.subr.mxu1 %v3070_v0 }
 0xae6   :  { %2806 = vmatpush3.msra.mxu0 %v3213_v31  ;;  %2811 = vmatprep.mubr.msk.f32.mxu0 %vm3071_vm0, %v3070_v0 }
 0xae7   :  { %2807 = vmatprep.subr.mxu0 %v3070_v0 }
 0xae8   :  { %2808 = vmatpush3.msra.mxu0 %v3242_v36 }
 0xae9   :  { %2809 = vmatprep.subr.mxu0 %v3070_v0 }
 0xaea   :  { %2810 = vmatpush3.msra.mxu0 %v3263_v40 }
 0xaeb   :  { %2825 = vmatprep.subr.mxu0 %v3070_v0 }
 0xb9a   :  { %v1173_v18 = vpop.f32.mrf.mxu0 }
 0xb9b   :  { %v1248_v20 = vpop.f32.mrf.mxu1 }
 0xb9c   :  { %v1249_v21 = vadd.f32 %v1248_v20, %v1173_v18  ;;  %v2769_v22 = vpop.f32.mrf.mxu0 }
 0xb9d   :  { %v2780_v23 = vpop.f32.mrf.mxu1 }
 0xb9e   :  { %v1252_v19 = vadd.f32 %v3320_v53, %v1249_v21 }
 0xba0   :  { %2984 = vtanh.f32 %v1252_v19  ;;  %v2475_v37 = vmul.f32 -1.442695, %v1252_v19 }
 0xba2   :  { %v1343_v26 = vpop.f32.mrf.mxu0 }
 0xba3   :  { %v1347_v27 = vadd.f32 %v1343_v26, %v180_v24 }
 0xba4   :  { %v2791_v25 = vpop.f32.mrf.mxu0 }
 0xba5   :  { %2986 = vtanh.f32 %v1347_v27  ;;  %v2477_v38 = vmul.f32 -1.442695, %v1347_v27 }
 0xba6   :  { %2988 = vpow2.f32 %v2475_v37 }
 0xba7   :  { %2990 = vpow2.f32 %v2477_v38 }
 0xbad   :  { %v2985_v32 = vpop.eup %2984 }
 0xbae   :  { %1262 = vrot.lane.b32.xlu0 %v2985_v32, %s3072_s26 }
 0xbb2   :  { %v2987_v34 = vpop.eup %2986 }
 0xbb3   :  { %1357 = vrot.lane.b32.xlu1 %v2987_v34, %s3072_s26  ;;  %v2989_v39 = vpop.eup %2988 }
 0xbb4   :  { %v1256_v41 = vadd.f32 1.0, %v2989_v39  ;;  %v2991_v42 = vpop.eup %2990 }
 0xbb5   :  { %v1351_v43 = vadd.f32 1.0, %v2991_v42 }
 0xbb6   :  { %2992 = vrcp.f32 %v1256_v41 }
 0xbb7   :  { %2994 = vrcp.f32 %v1351_v43 }
 0xbc3   :  { %v2993_v49 = vpop.eup %2992 }
 0xbc4   :  { %v2995_v52 = vpop.eup %2994  ;;  %v1260_v55 = vmul.f32 %v2993_v49, %v3432_v5 }
 0xbc5   :  { %v1355_v58 = vmul.f32 %v2995_v52, %v3434_v6 }
 0xc20   :  { %v1263_v44 = vpop.permute.xlu0 %1262 }
 0xc21   :  { %v1265_v45 = vmul.f32 %v2993_v49, %v1263_v44 }
 0xc23   :  { %1267 = vrot.lane.b32.xlu0 %v1265_v45, %s3072_s26 }
 0xc25   :  { %v1358_v46 = vpop.permute.xlu1 %1357 }
 0xc26   :  { %v1360_v54 = vmul.f32 %v2995_v52, %v1358_v46 }
 0xc28   :  { %1362 = vrot.lane.b32.xlu1 %v1360_v54, %s3072_s26 }
 0xc95   :  { %v1268_v56 = vpop.permute.xlu0 %1267 }
 0xc96   :  { %v3483_v57 = vadd.f32 %v1268_v56, %v1260_v55  ;;  %v3551_v55 = vld [vmem:[%s3718_s3 + $0x18] sm:$0xff]  ;;  %v3560_v56 = vld [vmem:[%s3718_s3 + $0x10] sm:$0xff] }
 0xc98   :  { %2996 = vtanh.f32 %v3483_v57 }
 0xc9a   :  { %v1363_v59 = vpop.permute.xlu1 %1362 }
 0xc9b   :  { %v3487_v60 = vadd.f32 %v1363_v59, %v1355_v58  ;;  %v3603_v59 = vld [vmem:[%s3720_s2] ss:$0 sm:$0xff] }
 0xc9d   :  { %2998 = vtanh.f32 %v3487_v60 }
 0xca5   :  { %v2997_v61 = vpop.eup %2996 }
 0xca6   :  { %1273 = vrot.lane.b32.xlu0 %v2997_v61, %s3072_s26 }
 0xcaa   :  { %v2999_v62 = vpop.eup %2998 }
 0xcab   :  { %1368 = vrot.lane.b32.xlu1 %v2999_v62, %s3072_s26 }
 0xd18   :  { %v1274_v63 = vpop.permute.xlu0 %1273 }
 0xd19   :  { %v1276_v47 = vmul.f32 %v2993_v49, %v1274_v63 }
 0xd1b   :  { %1373 = vrot.lane.b32.xlu0 %v1276_v47, %s3073_s0 }
 0xd1d   :  { %v1369_v1 = vpop.permute.xlu1 %1368 }
 0xd1e   :  { %v1371_v3 = vmul.f32 %v2995_v52, %v1369_v1 }
 0xd20   :  { %1448 = vrot.lane.b32.xlu1 %v1371_v3, %s3073_s0 }
 0xd8d   :  { %v1374_v5 = vpop.permute.xlu0 %1373 }
 0xd8e   :  { %2801 = vmatmul.mubr.msk.f32.vlgmr.msra.gmra.mxu1 %vm198_vm2, %v1374_v5 }
 0xd8f   :  { %2815 = vmatpush3.msra.mxu1 %v3131_v2  ;;  %2822 = vmatprep.mubr.msk.f32.mxu1 %vm3071_vm0, %v3070_v0 }
 0xd90   :  { %2816 = vmatprep.subr.mxu1 %v3070_v0 }
 0xd91   :  { %2817 = vmatpush3.msra.mxu1 %v3142_v4 }
 0xd92   :  { %2818 = vmatprep.subr.mxu1 %v3070_v0  ;;  %v1449_v6 = vpop.permute.xlu1 %1448 }
 0xd93   :  { %2819 = vmatpush3.msra.mxu1 %v3155_v7  ;;  %2812 = vmatmul.mubr.msk.f32.vlgmr.msra.gmra.mxu0 %vm198_vm2, %v1449_v6 }
 0xd94   :  { %2820 = vmatprep.subr.mxu1 %v3070_v0  ;;  %2826 = vmatpush3.msra.mxu0 %v3201_v29 }
 0xd95   :  { %2821 = vmatpush3.msra.mxu1 %v3163_v8  ;;  %2827 = vmatprep.subr.mxu0 %v3070_v0 }
 0xd96   :  { %2823 = vmatmul.mubr.msk.f32.vlgmr.msra.gmra.mxu1 %vm198_vm2, %v1449_v6  ;;  %2836 = vmatprep.subr.mxu1 %v3070_v0 }
 0xd97   :  { %2837 = vmatpush3.msra.mxu1 %v3195_v28  ;;  %2828 = vmatpush3.msra.mxu0 %v3206_v30 }
 0xd98   :  { %2838 = vmatprep.subr.mxu1 %v3070_v0  ;;  %2829 = vmatprep.subr.mxu0 %v3070_v0 }
 0xd99   :  { %2839 = vmatpush3.msra.mxu1 %v3213_v31  ;;  %2830 = vmatpush3.msra.mxu0 %v3223_v33 }
 0xd9a   :  { %2840 = vmatprep.subr.mxu1 %v3070_v0  ;;  %2831 = vmatprep.subr.mxu0 %v3070_v0 }
 0xd9b   :  { %2841 = vmatpush3.msra.mxu1 %v3242_v36  ;;  %2832 = vmatpush3.msra.mxu0 %v3235_v35 }
 0xd9c   :  { %2842 = vmatprep.subr.mxu1 %v3070_v0  ;;  %2844 = vmatprep.mubr.msk.f32.mxu1 %vm3071_vm0, %v3070_v0 }
 0xd9d   :  { %2843 = vmatpush3.msra.mxu1 %v3263_v40  ;;  %2833 = vmatprep.mubr.msk.f32.mxu0 %vm3071_vm0, %v3070_v0 }
 0xd9e   :  { %2847 = vmatprep.subr.mxu0 %v3070_v0  ;;  %2858 = vmatprep.subr.mxu1 %v3070_v0 }
 0xe4e   :  { %v1443_v2 = vpop.f32.mrf.mxu1 }
 0xe50   :  { %v2802_v4 = vpop.f32.mrf.mxu1 }
 0xe53   :  { %v1518_v7 = vpop.f32.mrf.mxu0 }
 0xe54   :  { %v1519_v8 = vadd.f32 %v1518_v7, %v1443_v2 }
 0xe55   :  { %v2813_v11 = vpop.f32.mrf.mxu0 }
 0xe56   :  { %v1522_v12 = vadd.f32 %v3320_v53, %v1519_v8  ;;  %v1613_v13 = vpop.f32.mrf.mxu1 }
 0xe57   :  { %v1617_v14 = vadd.f32 %v1613_v13, %v185_v9 }
 0xe58   :  { %3000 = vtanh.f32 %v1522_v12  ;;  %v2824_v15 = vpop.f32.mrf.mxu1  ;;  %v2480_v18 = vmul.f32 -1.442695, %v1522_v12 }
 0xe59   :  { %3002 = vtanh.f32 %v1617_v14  ;;  %v2482_v20 = vmul.f32 -1.442695, %v1617_v14 }
 0xe5a   :  { %3004 = vpow2.f32 %v2480_v18 }
 0xe5b   :  { %3006 = vpow2.f32 %v2482_v20 }
 0xe65   :  { %v3001_v16 = vpop.eup %3000 }
 0xe66   :  { %v3003_v17 = vpop.eup %3002  ;;  %1532 = vrot.lane.b32.xlu0 %v3001_v16, %s3072_s26 }
 0xe67   :  { %1627 = vrot.lane.b32.xlu1 %v3003_v17, %s3072_s26  ;;  %v3005_v21 = vpop.eup %3004 }
 0xe68   :  { %v3007_v10 = vpop.eup %3006  ;;  %v1526_v48 = vadd.f32 1.0, %v3005_v21 }
 0xe69   :  { %v1621_v22 = vadd.f32 1.0, %v3007_v10 }
 0xe6a   :  { %3008 = vrcp.f32 %v1526_v48 }
 0xe6b   :  { %3010 = vrcp.f32 %v1621_v22 }
 0xe77   :  { %v3009_v23 = vpop.eup %3008 }
 0xe78   :  { %v3011_v24 = vpop.eup %3010  ;;  %v1530_v32 = vmul.f32 %v3009_v23, %v3483_v57  ;;  %v3569_v57 = vld [vmem:[%s3718_s3 + $0x8] sm:$0xff] }
 0xe79   :  { %v1625_v34 = vmul.f32 %v3011_v24, %v3487_v60 }
 0xed8   :  { %v1533_v19 = vpop.permute.xlu0 %1532 }
 0xed9   :  { %v1628_v26 = vpop.permute.xlu1 %1627  ;;  %v1535_v27 = vmul.f32 %v3009_v23, %v1533_v19 }
 0xeda   :  { %v1630_v25 = vmul.f32 %v3011_v24, %v1628_v26  ;;  %v3062_v26 = vld [vmem:[%s3721_s4 + $0x18] sm:$0xff] }
 0xedb   :  { %1537 = vrot.lane.b32.xlu0 %v1535_v27, %s3072_s26  ;;  %v3063_v27 = vld [vmem:[%s3722_s5 + $0x10] sm:$0xff] }
 0xedc   :  { %1632 = vrot.lane.b32.xlu1 %v1630_v25, %s3072_s26  ;;  %v3064_v25 = vld [vmem:[%s3721_s4 + $0x10] sm:$0xff] }
 0xf4d   :  { %v1538_v37 = vpop.permute.xlu0 %1537 }
 0xf4e   :  { %v1633_v38 = vpop.permute.xlu1 %1632  ;;  %v3536_v39 = vadd.f32 %v1538_v37, %v1530_v32  ;;  %v3065_v32 = vld [vmem:[%s3722_s5 + $0x8] sm:$0xff]  ;;  %v3067_v37 = vld [vmem:[%s3722_s5] sm:$0xff] }
 0xf4f   :  { %v3538_v41 = vadd.f32 %v1633_v38, %v1625_v34  ;;  %v3066_v34 = vld [vmem:[%s3721_s4 + $0x8] sm:$0xff]  ;;  %v3068_v38 = vld [vmem:[%s3721_s4] sm:$0xff] }
 0xf50   :  { %3012 = vtanh.f32 %v3536_v39 }
 0xf51   :  { %3014 = vtanh.f32 %v3538_v41 }
 0xf5d   :  { %v3013_v42 = vpop.eup %3012 }
 0xf5e   :  { %v3015_v43 = vpop.eup %3014  ;;  %1543 = vrot.lane.b32.xlu0 %v3013_v42, %s3072_s26 }
 0xf5f   :  { %1638 = vrot.lane.b32.xlu1 %v3015_v43, %s3072_s26 }
 0xfd0   :  { %v1544_v49 = vpop.permute.xlu0 %1543 }
 0xfd1   :  { %v1639_v44 = vpop.permute.xlu1 %1638  ;;  %v1546_v45 = vmul.f32 %v3009_v23, %v1544_v49  ;;  %v195_v49 = vadd.f32 %v3603_v59, %v3311_v50 }
 0xfd2   :  { %v1641_v52 = vmul.f32 %v3011_v24, %v1639_v44  ;;  %v3061_v24 = vld [vmem:[%s3722_s5 + $0x18] sm:$0xff] }
 0xfd3   :  { %1643 = vrot.lane.b32.xlu0 %v1546_v45, %s3073_s0 }
 0xfd4   :  { %1718 = vrot.lane.b32.xlu1 %v1641_v52, %s3073_s0 }
0x1045   :  { %v1644_v46 = vpop.permute.xlu0 %1643 }
0x1046   :  { %v1719_v54 = vpop.permute.xlu1 %1718  ;;  %2834 = vmatmul.mubr.msk.f32.vlgmr.msra.gmra.mxu0 %vm198_vm2, %v1644_v46 }
0x1047   :  { %2845 = vmatmul.mubr.msk.f32.vlgmr.msra.gmra.mxu1 %vm198_vm2, %v1719_v54  ;;  %2848 = vmatpush3.msra.mxu0 %v3551_v55 }
0x1048   :  { %2849 = vmatprep.subr.mxu0 %v3070_v0  ;;  %2855 = vmatprep.mubr.msk.f32.mxu0 %vm3071_vm0, %v3070_v0 }
0x1049   :  { %2850 = vmatpush3.msra.mxu0 %v3560_v56  ;;  %2859 = vmatpush3.msra.mxu1 %v3201_v29  ;;  %v3578_v29 = vld [vmem:[%s3718_s3] sm:$0xff] }
0x104a   :  { %2851 = vmatprep.subr.mxu0 %v3070_v0  ;;  %2860 = vmatprep.subr.mxu1 %v3070_v0 }
0x104b   :  { %2852 = vmatpush3.msra.mxu0 %v3569_v57  ;;  %2861 = vmatpush3.msra.mxu1 %v3206_v30 }
0x104c   :  { %2853 = vmatprep.subr.mxu0 %v3070_v0  ;;  %2862 = vmatprep.subr.mxu1 %v3070_v0 }
0x104d   :  { %2854 = vmatpush3.msra.mxu0 %v3578_v29  ;;  %2863 = vmatpush3.msra.mxu1 %v3223_v33 }
0x104e   :  { %2856 = vmatmul.mubr.msk.f32.vlgmr.msra.gmra.mxu0 %vm198_vm2, %v1719_v54  ;;  %2864 = vmatprep.subr.mxu1 %v3070_v0 }
0x104f   :  { %2869 = vmatprep.subr.mxu0 %v3070_v0  ;;  %2865 = vmatpush3.msra.mxu1 %v3235_v35 }
0x1050   :  { %2870 = vmatpush3.msra.mxu0 %v3195_v28  ;;  %2866 = vmatprep.mubr.msk.f32.mxu1 %vm3071_vm0, %v3070_v0 }
0x1051   :  { %2871 = vmatprep.subr.mxu0 %v3070_v0  ;;  %2880 = vmatprep.subr.mxu1 %v3070_v0 }
0x1052   :  { %2872 = vmatpush3.msra.mxu0 %v3213_v31  ;;  %2877 = vmatprep.mubr.msk.f32.mxu0 %vm3071_vm0, %v3070_v0 }
0x1053   :  { %2873 = vmatprep.subr.mxu0 %v3070_v0 }
0x1054   :  { %2874 = vmatpush3.msra.mxu0 %v3242_v36  ;;  %v190_v36 = vadd.f32 %v3603_v59, %v3313_v51 }
0x1055   :  { %2875 = vmatprep.subr.mxu0 %v3070_v0 }
0x1056   :  { %2876 = vmatpush3.msra.mxu0 %v3263_v40 }
0x1057   :  { %2891 = vmatprep.subr.mxu0 %v3070_v0 }
0x1106   :  { %v1713_v28 = vpop.f32.mrf.mxu0 }
0x1107   :  { %v1788_v30 = vpop.f32.mrf.mxu1 }
0x1108   :  { %v1789_v33 = vadd.f32 %v1788_v30, %v1713_v28  ;;  %v2835_v35 = vpop.f32.mrf.mxu0 }
0x1109   :  { %v2846_v58 = vpop.f32.mrf.mxu1 }
0x110a   :  { %v1792_v31 = vadd.f32 %v3320_v53, %v1789_v33 }
0x110c   :  { %3016 = vtanh.f32 %v1792_v31  ;;  %v2485_v47 = vmul.f32 -1.442695, %v1792_v31 }
0x110e   :  { %v1883_v60 = vpop.f32.mrf.mxu0 }
0x110f   :  { %v1887_v40 = vadd.f32 %v1883_v60, %v190_v36 }
0x1110   :  { %v2857_v61 = vpop.f32.mrf.mxu0 }
0x1111   :  { %3018 = vtanh.f32 %v1887_v40  ;;  %v2487_v1 = vmul.f32 -1.442695, %v1887_v40 }
0x1112   :  { %3020 = vpow2.f32 %v2485_v47 }
0x1113   :  { %3022 = vpow2.f32 %v2487_v1 }
0x1119   :  { %v3017_v62 = vpop.eup %3016 }
0x111a   :  { %1802 = vrot.lane.b32.xlu0 %v3017_v62, %s3072_s26 }
0x111e   :  { %v3019_v63 = vpop.eup %3018 }
0x111f   :  { %1897 = vrot.lane.b32.xlu1 %v3019_v63, %s3072_s26  ;;  %v3021_v3 = vpop.eup %3020 }
0x1120   :  { %v1796_v5 = vadd.f32 1.0, %v3021_v3  ;;  %v3023_v6 = vpop.eup %3022 }
0x1121   :  { %v1891_v2 = vadd.f32 1.0, %v3023_v6 }
0x1122   :  { %3024 = vrcp.f32 %v1796_v5 }
0x1123   :  { %3026 = vrcp.f32 %v1891_v2 }
0x112f   :  { %v3025_v51 = vpop.eup %3024 }
0x1130   :  { %v3027_v8 = vpop.eup %3026  ;;  %v1800_v12 = vmul.f32 %v3025_v51, %v3536_v39 }
0x1131   :  { %v1895_v15 = vmul.f32 %v3027_v8, %v3538_v41 }
0x118c   :  { %v1803_v4 = vpop.permute.xlu0 %1802 }
0x118d   :  { %v1805_v7 = vmul.f32 %v3025_v51, %v1803_v4 }
0x118f   :  { %1807 = vrot.lane.b32.xlu0 %v1805_v7, %s3072_s26 }
0x1191   :  { %v1898_v9 = vpop.permute.xlu1 %1897 }
0x1192   :  { %v1900_v11 = vmul.f32 %v3027_v8, %v1898_v9 }
0x1194   :  { %1902 = vrot.lane.b32.xlu1 %v1900_v11, %s3072_s26 }
0x1201   :  { %v1808_v13 = vpop.permute.xlu0 %1807 }
0x1202   :  { %v3612_v14 = vadd.f32 %v1808_v13, %v1800_v12 }
0x1204   :  { %3028 = vtanh.f32 %v3612_v14 }
0x1206   :  { %v1903_v16 = vpop.permute.xlu1 %1902 }
0x1207   :  { %v3616_v17 = vadd.f32 %v1903_v16, %v1895_v15 }
0x1209   :  { %3030 = vtanh.f32 %v3616_v17 }
0x1211   :  { %v3029_v18 = vpop.eup %3028 }
0x1212   :  { %1813 = vrot.lane.b32.xlu0 %v3029_v18, %s3072_s26 }
0x1216   :  { %v3031_v20 = vpop.eup %3030 }
0x1217   :  { %1908 = vrot.lane.b32.xlu1 %v3031_v20, %s3072_s26 }
0x1284   :  { %v1814_v21 = vpop.permute.xlu0 %1813 }
0x1285   :  { %v1816_v10 = vmul.f32 %v3025_v51, %v1814_v21 }
0x1287   :  { %1913 = vrot.lane.b32.xlu0 %v1816_v10, %s3073_s0 }
0x1289   :  { %v1909_v48 = vpop.permute.xlu1 %1908 }
0x128a   :  { %v1911_v22 = vmul.f32 %v3027_v8, %v1909_v48 }
0x128c   :  { %1988 = vrot.lane.b32.xlu1 %v1911_v22, %s3073_s0 }
0x12f9   :  { %v1914_v23 = vpop.permute.xlu0 %1913 }
0x12fa   :  { %2867 = vmatmul.mubr.msk.f32.vlgmr.msra.gmra.mxu1 %vm198_vm2, %v1914_v23 }
0x12fb   :  { %2881 = vmatpush3.msra.mxu1 %v3551_v55  ;;  %2888 = vmatprep.mubr.msk.f32.mxu1 %vm3071_vm0, %v3070_v0 }
0x12fc   :  { %2882 = vmatprep.subr.mxu1 %v3070_v0 }
0x12fd   :  { %2883 = vmatpush3.msra.mxu1 %v3560_v56 }
0x12fe   :  { %2884 = vmatprep.subr.mxu1 %v3070_v0  ;;  %v1989_v19 = vpop.permute.xlu1 %1988 }
0x12ff   :  { %2885 = vmatpush3.msra.mxu1 %v3569_v57  ;;  %2878 = vmatmul.mubr.msk.f32.vlgmr.msra.gmra.mxu0 %vm198_vm2, %v1989_v19 }
0x1300   :  { %2886 = vmatprep.subr.mxu1 %v3070_v0  ;;  %2892 = vmatpush3.msra.mxu0 %v3061_v24  ;;  %v2360_v24 = vld [vmem:[%s3724_s7 + $0x18] sm:$0xff] }
0x1301   :  { %2887 = vmatpush3.msra.mxu1 %v3578_v29  ;;  %2893 = vmatprep.subr.mxu0 %v3070_v0 }
0x1302   :  { %2889 = vmatmul.mubr.msk.f32.vlgmr.msra.gmra.mxu1 %vm198_vm2, %v1989_v19  ;;  %2902 = vmatprep.subr.mxu1 %v3070_v0 }
0x1303   :  { %2903 = vmatpush3.msra.mxu1 %v3062_v26  ;;  %2894 = vmatpush3.msra.mxu0 %v3063_v27  ;;  %v2359_v26 = vld [vmem:[%s3724_s7 + $0x10] sm:$0xff]  ;;  %v2358_v27 = vld [vmem:[%s3724_s7 + $0x8] sm:$0xff] }
0x1304   :  { %2904 = vmatprep.subr.mxu1 %v3070_v0  ;;  %2895 = vmatprep.subr.mxu0 %v3070_v0 }
0x1305   :  { %2905 = vmatpush3.msra.mxu1 %v3064_v25  ;;  %2896 = vmatpush3.msra.mxu0 %v3065_v32  ;;  %v2357_v25 = vld [vmem:[%s3724_s7] sm:$0xff] }
0x1306   :  { %2906 = vmatprep.subr.mxu1 %v3070_v0  ;;  %2897 = vmatprep.subr.mxu0 %v3070_v0 }
0x1307   :  { %2907 = vmatpush3.msra.mxu1 %v3066_v34  ;;  %2910 = vmatprep.mubr.msk.f32.mxu1 %vm3071_vm0, %v3070_v0 }
0x1308   :  { %2908 = vmatprep.subr.mxu1 %v3070_v0  ;;  %2898 = vmatpush3.msra.mxu0 %v3067_v37 }
0x1309   :  { %2909 = vmatpush3.msra.mxu1 %v3068_v38  ;;  %2899 = vmatprep.mubr.msk.f32.mxu0 %vm3071_vm0, %v3070_v0 }
0x130a   :  { %2913 = vmatprep.subr.mxu0 %v3070_v0 }
0x13ba   :  { %v1983_v39 = vpop.f32.mrf.mxu1 }
0x13bc   :  { %v2868_v41 = vpop.f32.mrf.mxu1 }
0x13bf   :  { %v2058_v42 = vpop.f32.mrf.mxu0 }
0x13c0   :  { %v2059_v43 = vadd.f32 %v2058_v42, %v1983_v39  ;;  %v2496_v39 = vld [vmem:[%s3725_s8] ss:$0 sm:$0xff] }
0x13c1   :  { %v2879_v44 = vpop.f32.mrf.mxu0 }
0x13c2   :  { %v2062_v45 = vadd.f32 %v3320_v53, %v2059_v43  ;;  %v2153_v52 = vpop.f32.mrf.mxu1 }
0x13c3   :  { %v2157_v46 = vadd.f32 %v2153_v52, %v195_v49 }
0x13c4   :  { %3032 = vtanh.f32 %v2062_v45  ;;  %v2890_v54 = vpop.f32.mrf.mxu1  ;;  %v2490_v57 = vmul.f32 -1.442695, %v2062_v45 }
0x13c5   :  { %3034 = vtanh.f32 %v2157_v46  ;;  %v2492_v29 = vmul.f32 -1.442695, %v2157_v46 }
0x13c6   :  { %3036 = vpow2.f32 %v2490_v57 }
0x13c7   :  { %3038 = vpow2.f32 %v2492_v29 }
0x13d1   :  { %v3033_v55 = vpop.eup %3032 }
0x13d2   :  { %v3035_v56 = vpop.eup %3034  ;;  %2072 = vrot.lane.b32.xlu0 %v3033_v55, %s3072_s26 }
0x13d3   :  { %2167 = vrot.lane.b32.xlu1 %v3035_v56, %s3072_s26  ;;  %v3037_v28 = vpop.eup %3036 }
0x13d4   :  { %v3039_v50 = vpop.eup %3038  ;;  %v2066_v30 = vadd.f32 1.0, %v3037_v28 }
0x13d5   :  { %v2161_v33 = vadd.f32 1.0, %v3039_v50 }
0x13d6   :  { %3040 = vrcp.f32 %v2066_v30 }
0x13d7   :  { %3042 = vrcp.f32 %v2161_v33 }
0x13e3   :  { %v3041_v53 = vpop.eup %3040 }
0x13e4   :  { %v3043_v58 = vpop.eup %3042  ;;  %v2070_v60 = vmul.f32 %v3041_v53, %v3612_v14  ;;  %v3069_v14 = vld [vmem:[%s3723_s6] ss:$0 sm:$0xff] }
0x13e5   :  { %v2165_v40 = vmul.f32 %v3043_v58, %v3616_v17 }
0x1444   :  { %v2073_v35 = vpop.permute.xlu0 %2072 }
0x1445   :  { %v2168_v31 = vpop.permute.xlu1 %2167  ;;  %v2075_v59 = vmul.f32 %v3041_v53, %v2073_v35 }
0x1446   :  { %v2170_v36 = vmul.f32 %v3043_v58, %v2168_v31 }
0x1447   :  { %2077 = vrot.lane.b32.xlu0 %v2075_v59, %s3072_s26 }
0x1448   :  { %2172 = vrot.lane.b32.xlu1 %v2170_v36, %s3072_s26 }
0x14b9   :  { %v2078_v61 = vpop.permute.xlu0 %2077 }
0x14ba   :  { %v2173_v62 = vpop.permute.xlu1 %2172  ;;  %v2080_v63 = vadd.f32 %v2078_v61, %v2070_v60 }
0x14bb   :  { %v2175_v47 = vadd.f32 %v2173_v62, %v2165_v40 }
0x14bc   :  { %3044 = vtanh.f32 %v2080_v63 }
0x14bd   :  { %3046 = vtanh.f32 %v2175_v47 }
0x14c9   :  { %v3045_v1 = vpop.eup %3044 }
0x14ca   :  { %v3047_v3 = vpop.eup %3046  ;;  %2083 = vrot.lane.b32.xlu0 %v3045_v1, %s3072_s26 }
0x14cb   :  { %2178 = vrot.lane.b32.xlu1 %v3047_v3, %s3072_s26 }
0x153c   :  { %v2084_v5 = vpop.permute.xlu0 %2083 }
0x153d   :  { %v2179_v6 = vpop.permute.xlu1 %2178  ;;  %v2086_v2 = vmul.f32 %v3041_v53, %v2084_v5 }
0x153e   :  { %v2181_v51 = vmul.f32 %v3043_v58, %v2179_v6 }
0x153f   :  { %2183 = vrot.lane.b32.xlu0 %v2086_v2, %s3073_s0 }
0x1540   :  { %2258 = vrot.lane.b32.xlu1 %v2181_v51, %s3073_s0 }
0x15b1   :  { %v2184_v4 = vpop.permute.xlu0 %2183 }
0x15b2   :  { %v2259_v7 = vpop.permute.xlu1 %2258  ;;  %2900 = vmatmul.mubr.msk.f32.vlgmr.msra.gmra.mxu0 %vm198_vm2, %v2184_v4 }
0x15b3   :  { %2911 = vmatmul.mubr.msk.f32.vlgmr.msra.gmra.mxu1 %vm198_vm2, %v2259_v7  ;;  %2921 = vmatprep.mubr.msk.f32.mxu0 %vm3071_vm0, %v3070_v0 }
0x15b4   :  { %2914 = vmatpush3.msra.mxu0 %v2360_v24 }
0x15b5   :  { %2915 = vmatprep.subr.mxu0 %v3070_v0 }
0x15b6   :  { %2916 = vmatpush3.msra.mxu0 %v2359_v26 }
0x15b7   :  { %2917 = vmatprep.subr.mxu0 %v3070_v0 }
0x15b8   :  { %2918 = vmatpush3.msra.mxu0 %v2358_v27 }
0x15b9   :  { %2919 = vmatprep.subr.mxu0 %v3070_v0 }
0x15ba   :  { %2920 = vmatpush3.msra.mxu0 %v2357_v25 }
0x1672   :  { %v2253_v8 = vpop.f32.mrf.mxu0 }
0x1673   :  { %v2328_v9 = vpop.f32.mrf.mxu1 }
0x1674   :  { %v2329_v11 = vadd.f32 %v2328_v9, %v2253_v8  ;;  %v2901_v12 = vpop.f32.mrf.mxu0 }
0x1675   :  { %v2912_v13 = vpop.f32.mrf.mxu1 }
0x1676   :  { %v2332_v15 = vadd.f32 %v3069_v14, %v2329_v11 }
0x1678   :  { %3048 = vtanh.f32 %v2332_v15  ;;  %v2495_v17 = vmul.f32 -1.442695, %v2332_v15 }
0x167a   :  { %3050 = vpow2.f32 %v2495_v17 }
0x1685   :  { %v3049_v16 = vpop.eup %3048 }
0x1686   :  { %2342 = vrot.lane.b32.xlu0 %v3049_v16, %s3072_s26 }
0x1687   :  { %v3051_v18 = vpop.eup %3050 }
0x1688   :  { %v2336_v20 = vadd.f32 1.0, %v3051_v18 }
0x168a   :  { %3052 = vrcp.f32 %v2336_v20 }
0x1697   :  { %v3053_v21 = vpop.eup %3052 }
0x1698   :  { %v2340_v22 = vmul.f32 %v3053_v21, %v2080_v63 }
0x16f8   :  { %v2343_v10 = vpop.permute.xlu0 %2342 }
0x16f9   :  { %v2345_v48 = vmul.f32 %v3053_v21, %v2343_v10 }
0x16fb   :  { %2347 = vrot.lane.b32.xlu1 %v2345_v48, %s3072_s26 }
0x176d   :  { %v2348_v23 = vpop.permute.xlu1 %2347 }
0x176e   :  { %v2350_v19 = vadd.f32 %v2348_v23, %v2340_v22 }
0x1770   :  { %3054 = vtanh.f32 %v2350_v19 }
0x177d   :  { %v3055_v32 = vpop.eup %3054 }
0x177e   :  { %2353 = vrot.lane.b32.xlu0 %v3055_v32, %s3072_s26 }
0x17f0   :  { %v2354_v34 = vpop.permute.xlu0 %2353 }
0x17f1   :  { %v2356_v37 = vmul.f32 %v3053_v21, %v2354_v34 }
0x17f3   :  { %2369 = vrot.lane.b32.xlu1 %v2356_v37, %s3073_s0 }
0x1865   :  { %v2370_v38 = vpop.permute.xlu1 %2369 }
0x1866   :  { %2922 = vmatmul.mubr.msk.f32.vlgmr.msra.gmra.mxu0 %vm198_vm2, %v2370_v38 }
0x1926   :  { %v2439_v41 = vpop.f32.mrf.mxu0 }
0x1927   :  { %v2440_v42 = vadd.f32 %v2496_v39, %v2439_v41 }
0x1928   :  { %v2923_v43 = vpop.f32.mrf.mxu0 }
0x1929   :  { %2443 = vst [vmem:[%s3726_s9] sm:$0xff] %v2440_v42 }

</bundles_post_ra>
